<compile_context>
chip_gen: v7x
topology: tpu7x:2x2x1
jax: 0.10.0
libtpu: 0.0.40
codegen_flags: <defaults>
</compile_context>

<pallas_src>
import math
import functools

import jax
import jax.numpy as jnp
from jax.experimental import pallas as pl
from jax.experimental.pallas import tpu as pltpu

SEQUENCE_LENGTH = 8
TRANSFORMER_EMBED_DIM = 32
TRANSFORMER_NUM_HEADS = 4
TRANSFORMER_FF_DIM = 64
TRANSFORMER_NUM_LAYERS = 2
LN_EPS = 1e-5


# ----------------------------- kernel ---------------------------------------

def _layer_norm(x, gamma, beta):
    mu = jnp.mean(x, axis=-1, keepdims=True)
    var = jnp.mean(jnp.square(x - mu), axis=-1, keepdims=True)
    return (x - mu) * jax.lax.rsqrt(var + LN_EPS) * gamma + beta


def fused_encoder_kernel(src_ref, w_in_ref, b_in_ref, pe_ref,
                         wqkv_ref, bqkv_ref, wo_ref, bo_ref,
                         g1_ref, be1_ref, w1_ref, bf1_ref,
                         w2_ref, bf2_ref, g2_ref, be2_ref,
                         o_ref, *, nlayers, nheads):
    src = src_ref[...]                                   # (B, S)
    B, S = src.shape
    D = w_in_ref.shape[1]
    dh = D // nheads
    scale = 1.0 / math.sqrt(dh)
    N = B * S

    # ---- embed: Linear(1, D) on the unsqueezed scalar feature + positional enc ----
    x3 = (src[:, :, None] * w_in_ref[...][None]          # (B,S,1)*(1,1,D)
          + b_in_ref[...][None]
          + pe_ref[...][None])                           # (B, S, D)
    x = x3.reshape(N, D)                                 # leading-dim merge only

    for l in range(nlayers):                             # static unroll (L=2)
        # ------------- multi-head self attention (post-norm layer) -----------------
        # Fused QKV: one lane-dense matmul + one bias row for all heads.
        qkv = (jnp.dot(x, wqkv_ref[l], preferred_element_type=jnp.float32)
               + bqkv_ref[l])                            # (N, 3D)

        # Gather heads into a leading group dim g = h*B + b (major-dim concat only;
        # no lane-splitting reshapes / transposes).
        def heads(offset):
            return jnp.concatenate(
                [qkv[:, offset + h * dh: offset + (h + 1) * dh].reshape(B, S, dh)
                 for h in range(nheads)], axis=0)        # (H*B, S, dh)

        qg = heads(0)
        kg = heads(D)
        vg = heads(2 * D)

        # Head-batched attention: one scores einsum, one softmax, one context einsum.
        s = jnp.einsum('gqd,gkd->gqk', qg, kg,
                       preferred_element_type=jnp.float32) * scale   # (H*B, S, S)
        s = s - jnp.max(s, axis=-1, keepdims=True)
        e = jnp.exp(s)
        p = e * pl.reciprocal(jnp.sum(e, axis=-1, keepdims=True), approx=True)
        ctx = jnp.einsum('gqk,gkd->gqd', p, vg,
                         preferred_element_type=jnp.float32)          # (H*B, S, dh)

        # Reassemble heads along lanes (head-major order matches wo's row order),
        # then ONE fused out-projection matmul.
        ctx2 = jnp.concatenate(
            [ctx[h * B:(h + 1) * B].reshape(N, dh) for h in range(nheads)],
            axis=-1)                                                  # (N, D)
        attn = (jnp.dot(ctx2, wo_ref[l], preferred_element_type=jnp.float32)
                + bo_ref[l])

        # ---------------- residual + norm1 (post-norm) -----------------------------
        x = _layer_norm(x + attn, g1_ref[l], be1_ref[l])

        # ---------------- feed-forward (relu), dropout = identity ------------------
        h1 = jnp.dot(x, w1_ref[l], preferred_element_type=jnp.float32) + bf1_ref[l]
        h1 = jnp.maximum(h1, 0.0)
        ff = jnp.dot(h1, w2_ref[l], preferred_element_type=jnp.float32) + bf2_ref[l]

        # ---------------- residual + norm2 -----------------------------------------
        x = _layer_norm(x + ff, g2_ref[l], be2_ref[l])

    # ---- mean over sequence axis; final dropout is identity at inference ----------
    o_ref[...] = jnp.mean(x.reshape(B, S, D), axis=1)    # (B, D)


# ----------------------------- wrapper ---------------------------------------

_ARG_ORDER = ["w_in", "b_in", "pe", "wqkv", "bqkv", "wo", "bo",
              "g1", "be1", "w1", "bf1", "w2", "bf2", "g2", "be2"]


def transformer_encoder_forward(src, params):
    B, _ = src.shape
    D = TRANSFORMER_EMBED_DIM
    args = [params[k] for k in _ARG_ORDER]
    n_in = 1 + len(args)
    vmem = pl.BlockSpec(memory_space=pltpu.MemorySpace.VMEM)  # whole array resident in VMEM
    return pl.pallas_call(
        functools.partial(fused_encoder_kernel,
                          nlayers=TRANSFORMER_NUM_LAYERS,
                          nheads=TRANSFORMER_NUM_HEADS),
        out_shape=jax.ShapeDtypeStruct((B, D), jnp.float32),
        in_specs=[vmem] * n_in,
        out_specs=vmem,
    )(src, *args)


# ----------------------------- parameter setup --------------------------------

def make_positional_encoding(max_len, d_model):
    pos = jnp.arange(max_len, dtype=jnp.float32)[:, None]
    div = jnp.exp(jnp.arange(0, d_model, 2, dtype=jnp.float32)
                  * (-math.log(10000.0) / d_model))
    pe = jnp.zeros((max_len, d_model), dtype=jnp.float32)
    pe = pe.at[:, 0::2].set(jnp.sin(pos * div))
    pe = pe.at[:, 1::2].set(jnp.cos(pos * div))   # d_model is even
    return pe


def init_params(key):
    D, FF = TRANSFORMER_EMBED_DIM, TRANSFORMER_FF_DIM
    L = TRANSFORMER_NUM_LAYERS
    counter = [0]

    def rnd(shape, scale=0.1):
        counter[0] += 1
        return scale * jax.random.normal(jax.random.fold_in(key, counter[0]),
                                         shape, dtype=jnp.float32)

    params = {
        "w_in": rnd((1, D)),                     # nn.Linear(1, D): weight.T
        "b_in": rnd((1, D)),
        "pe": make_positional_encoding(SEQUENCE_LENGTH, D),
    }

    per_layer = {k: [] for k in _ARG_ORDER[3:]}  # layer-stacked arrays
    for _ in range(L):
        in_proj_w = rnd((3 * D, D))              # MultiheadAttention.in_proj_weight
        in_proj_b = rnd((3 * D,))                # in_proj_bias
        out_proj_w = rnd((D, D))                 # out_proj.weight
        out_proj_b = rnd((D,))                   # out_proj.bias

        per_layer["wqkv"].append(in_proj_w.T)                  # (D, 3D) lane-dense
        per_layer["bqkv"].append(in_proj_b.reshape(1, 3 * D))  # (1, 3D)
        per_layer["wo"].append(out_proj_w.T)                   # (D, D)
        per_layer["bo"].append(out_proj_b.reshape(1, D))
        per_layer["g1"].append(1.0 + rnd((1, D)))              # norm1.weight
        per_layer["be1"].append(rnd((1, D)))                   # norm1.bias
        per_layer["w1"].append(rnd((FF, D)).T)                 # linear1.weight.T
        per_layer["bf1"].append(rnd((FF,)).reshape(1, FF))
        per_layer["w2"].append(rnd((D, FF)).T)                 # linear2.weight.T
        per_layer["bf2"].append(rnd((D,)).reshape(1, D))
        per_layer["g2"].append(1.0 + rnd((1, D)))              # norm2.weight
        per_layer["be2"].append(rnd((1, D)))                   # norm2.bias

    for k, v in per_layer.items():
        params[k] = jnp.stack(v)                 # leading layer axis of size L
    return params


# ----------------------------- main --------------------------------------------

if __name__ == "__main__":
    B = 2
    key = jax.random.PRNGKey(0)
    k_src, k_par = jax.random.split(key)
    src = jax.random.normal(k_src, (B, SEQUENCE_LENGTH), dtype=jnp.float32)
    params = init_params(k_par)

    out = transformer_encoder_forward(src, params)
    out = jax.block_until_ready(out)

    assert out.shape == (B, TRANSFORMER_EMBED_DIM), out.shape
    assert bool(jnp.all(jnp.isfinite(out)))
    print("KERNEL_OK")
</pallas_src>

<mosaic_0001>
module attributes {stable_mosaic.version = 11 : i64} {
  func.func @fused_encoder_kernel(%arg0: memref<2x8xf32, #tpu.memory_space<vmem>>, %arg1: memref<1x32xf32, #tpu.memory_space<vmem>>, %arg2: memref<1x32xf32, #tpu.memory_space<vmem>>, %arg3: memref<8x32xf32, #tpu.memory_space<vmem>>, %arg4: memref<2x32x96xf32, #tpu.memory_space<vmem>>, %arg5: memref<2x1x96xf32, #tpu.memory_space<vmem>>, %arg6: memref<2x32x32xf32, #tpu.memory_space<vmem>>, %arg7: memref<2x1x32xf32, #tpu.memory_space<vmem>>, %arg8: memref<2x1x32xf32, #tpu.memory_space<vmem>>, %arg9: memref<2x1x32xf32, #tpu.memory_space<vmem>>, %arg10: memref<2x32x64xf32, #tpu.memory_space<vmem>>, %arg11: memref<2x1x64xf32, #tpu.memory_space<vmem>>, %arg12: memref<2x64x32xf32, #tpu.memory_space<vmem>>, %arg13: memref<2x1x32xf32, #tpu.memory_space<vmem>>, %arg14: memref<2x1x32xf32, #tpu.memory_space<vmem>>, %arg15: memref<2x1x32xf32, #tpu.memory_space<vmem>>, %arg16: memref<2x32xf32, #tpu.memory_space<vmem>>) attributes {dimension_semantics = [], scalar_prefetch = 0 : i64, scratch_operands = 0 : i64, tpu.core_type = #tpu.core_type<tc>} {
    %c0 = arith.constant 0 : index
    %c0_0 = arith.constant 0 : index
    %0 = vector.load %arg0[%c0, %c0_0] : memref<2x8xf32, #tpu.memory_space<vmem>>, vector<2x8xf32>
    %1 = vector.shape_cast %0 : vector<2x8xf32> to vector<2x8x1xf32>
    %c0_1 = arith.constant 0 : index
    %c0_2 = arith.constant 0 : index
    %2 = vector.load %arg1[%c0_1, %c0_2] : memref<1x32xf32, #tpu.memory_space<vmem>>, vector<1x32xf32>
    %3 = vector.shape_cast %2 : vector<1x32xf32> to vector<1x1x32xf32>
    %4 = vector.broadcast %1 : vector<2x8x1xf32> to vector<2x8x32xf32>
    %5 = vector.broadcast %3 : vector<1x1x32xf32> to vector<2x8x32xf32>
    %6 = arith.mulf %4, %5 : vector<2x8x32xf32>
    %c0_3 = arith.constant 0 : index
    %c0_4 = arith.constant 0 : index
    %7 = vector.load %arg2[%c0_3, %c0_4] : memref<1x32xf32, #tpu.memory_space<vmem>>, vector<1x32xf32>
    %8 = vector.shape_cast %7 : vector<1x32xf32> to vector<1x1x32xf32>
    %9 = vector.broadcast %8 : vector<1x1x32xf32> to vector<2x8x32xf32>
    %10 = arith.addf %6, %9 : vector<2x8x32xf32>
    %c0_5 = arith.constant 0 : index
    %c0_6 = arith.constant 0 : index
    %11 = vector.load %arg3[%c0_5, %c0_6] : memref<8x32xf32, #tpu.memory_space<vmem>>, vector<8x32xf32>
    %12 = vector.shape_cast %11 : vector<8x32xf32> to vector<1x8x32xf32>
    %13 = vector.broadcast %12 : vector<1x8x32xf32> to vector<2x8x32xf32>
    %14 = arith.addf %10, %13 : vector<2x8x32xf32>
    %15 = vector.shape_cast %14 : vector<2x8x32xf32> to vector<16x32xf32>
    %c0_7 = arith.constant 0 : index
    %c0_8 = arith.constant 0 : index
    %c0_9 = arith.constant 0 : index
    %16 = vector.load %arg4[%c0_7, %c0_8, %c0_9] : memref<2x32x96xf32, #tpu.memory_space<vmem>>, vector<1x32x96xf32>
    %17 = vector.shape_cast %16 : vector<1x32x96xf32> to vector<32x96xf32>
    %cst = arith.constant dense<0.000000e+00> : vector<16x96xf32>
    %18 = tpu.matmul %15, %17, %cst {dimension_numbers = #tpu.dot_dimension_numbers<[1], [0], [0], [1], [0, 0, 1, 1], [], []>} : vector<16x32xf32>, vector<32x96xf32>, vector<16x96xf32> -> vector<16x96xf32>
    %c0_10 = arith.constant 0 : index
    %c0_11 = arith.constant 0 : index
    %c0_12 = arith.constant 0 : index
    %19 = vector.load %arg5[%c0_10, %c0_11, %c0_12] : memref<2x1x96xf32, #tpu.memory_space<vmem>>, vector<1x1x96xf32>
    %20 = vector.shape_cast %19 : vector<1x1x96xf32> to vector<1x96xf32>
    %21 = vector.broadcast %20 : vector<1x96xf32> to vector<16x96xf32>
    %22 = arith.addf %18, %21 : vector<16x96xf32>
    %23 = vector.extract_strided_slice %22 {offsets = [0, 0], sizes = [16, 8], strides = [1, 1]} : vector<16x96xf32> to vector<16x8xf32>
    %24 = vector.shape_cast %23 : vector<16x8xf32> to vector<2x8x8xf32>
    %25 = vector.extract_strided_slice %22 {offsets = [0, 8], sizes = [16, 8], strides = [1, 1]} : vector<16x96xf32> to vector<16x8xf32>
    %26 = vector.shape_cast %25 : vector<16x8xf32> to vector<2x8x8xf32>
    %27 = vector.extract_strided_slice %22 {offsets = [0, 16], sizes = [16, 8], strides = [1, 1]} : vector<16x96xf32> to vector<16x8xf32>
    %28 = vector.shape_cast %27 : vector<16x8xf32> to vector<2x8x8xf32>
    %29 = vector.extract_strided_slice %22 {offsets = [0, 24], sizes = [16, 8], strides = [1, 1]} : vector<16x96xf32> to vector<16x8xf32>
    %30 = vector.shape_cast %29 : vector<16x8xf32> to vector<2x8x8xf32>
    %31 = tpu.concatenate %24, %26, %28, %30 in 0 : vector<2x8x8xf32>, vector<2x8x8xf32>, vector<2x8x8xf32>, vector<2x8x8xf32> -> vector<8x8x8xf32>
    %32 = vector.extract_strided_slice %22 {offsets = [0, 32], sizes = [16, 8], strides = [1, 1]} : vector<16x96xf32> to vector<16x8xf32>
    %33 = vector.shape_cast %32 : vector<16x8xf32> to vector<2x8x8xf32>
    %34 = vector.extract_strided_slice %22 {offsets = [0, 40], sizes = [16, 8], strides = [1, 1]} : vector<16x96xf32> to vector<16x8xf32>
    %35 = vector.shape_cast %34 : vector<16x8xf32> to vector<2x8x8xf32>
    %36 = vector.extract_strided_slice %22 {offsets = [0, 48], sizes = [16, 8], strides = [1, 1]} : vector<16x96xf32> to vector<16x8xf32>
    %37 = vector.shape_cast %36 : vector<16x8xf32> to vector<2x8x8xf32>
    %38 = vector.extract_strided_slice %22 {offsets = [0, 56], sizes = [16, 8], strides = [1, 1]} : vector<16x96xf32> to vector<16x8xf32>
    %39 = vector.shape_cast %38 : vector<16x8xf32> to vector<2x8x8xf32>
    %40 = tpu.concatenate %33, %35, %37, %39 in 0 : vector<2x8x8xf32>, vector<2x8x8xf32>, vector<2x8x8xf32>, vector<2x8x8xf32> -> vector<8x8x8xf32>
    %41 = vector.extract_strided_slice %22 {offsets = [0, 64], sizes = [16, 8], strides = [1, 1]} : vector<16x96xf32> to vector<16x8xf32>
    %42 = vector.shape_cast %41 : vector<16x8xf32> to vector<2x8x8xf32>
    %43 = vector.extract_strided_slice %22 {offsets = [0, 72], sizes = [16, 8], strides = [1, 1]} : vector<16x96xf32> to vector<16x8xf32>
    %44 = vector.shape_cast %43 : vector<16x8xf32> to vector<2x8x8xf32>
    %45 = vector.extract_strided_slice %22 {offsets = [0, 80], sizes = [16, 8], strides = [1, 1]} : vector<16x96xf32> to vector<16x8xf32>
    %46 = vector.shape_cast %45 : vector<16x8xf32> to vector<2x8x8xf32>
    %47 = vector.extract_strided_slice %22 {offsets = [0, 88], sizes = [16, 8], strides = [1, 1]} : vector<16x96xf32> to vector<16x8xf32>
    %48 = vector.shape_cast %47 : vector<16x8xf32> to vector<2x8x8xf32>
    %49 = tpu.concatenate %42, %44, %46, %48 in 0 : vector<2x8x8xf32>, vector<2x8x8xf32>, vector<2x8x8xf32>, vector<2x8x8xf32> -> vector<8x8x8xf32>
    "tpu.trace_start"() <{level = 10 : i32, message = "gqd,gkd->gqk"}> : () -> ()
    %cst_13 = arith.constant dense<0.000000e+00> : vector<8x8x8xf32>
    %50 = tpu.matmul %31, %40, %cst_13 {dimension_numbers = #tpu.dot_dimension_numbers<[2], [2], [1], [1], [0, 0, 0, 1, 1, 1], [0], [0]>} : vector<8x8x8xf32>, vector<8x8x8xf32>, vector<8x8x8xf32> -> vector<8x8x8xf32>
    "tpu.trace_stop"() : () -> ()
    %cst_14 = arith.constant 0.353553385 : f32
    %51 = vector.broadcast %cst_14 : f32 to vector<8x8x8xf32>
    %52 = arith.mulf %50, %51 : vector<8x8x8xf32>
    %cst_15 = arith.constant dense<0xFF800000> : vector<8x8xf32>
    %53 = vector.multi_reduction <maximumf>, %52, %cst_15 [2] : vector<8x8x8xf32> to vector<8x8xf32>
    %54 = vector.shape_cast %53 : vector<8x8xf32> to vector<8x8x1xf32>
    %55 = vector.broadcast %54 : vector<8x8x1xf32> to vector<8x8x8xf32>
    %56 = arith.subf %52, %55 : vector<8x8x8xf32>
    %57 = math.exp %56 : vector<8x8x8xf32>
    %cst_16 = arith.constant dense<0.000000e+00> : vector<8x8xf32>
    %58 = vector.multi_reduction <add>, %57, %cst_16 [2] : vector<8x8x8xf32> to vector<8x8xf32>
    %59 = vector.shape_cast %58 : vector<8x8xf32> to vector<8x8x1xf32>
    %60 = tpu.reciprocal %59 {approx = true} : vector<8x8x1xf32> -> vector<8x8x1xf32>
    %61 = vector.broadcast %60 : vector<8x8x1xf32> to vector<8x8x8xf32>
    %62 = arith.mulf %57, %61 : vector<8x8x8xf32>
    "tpu.trace_start"() <{level = 10 : i32, message = "gqk,gkd->gqd"}> : () -> ()
    %cst_17 = arith.constant dense<0.000000e+00> : vector<8x8x8xf32>
    %63 = tpu.matmul %62, %49, %cst_17 {dimension_numbers = #tpu.dot_dimension_numbers<[2], [1], [1], [2], [0, 0, 0, 1, 1, 2], [0], [0]>} : vector<8x8x8xf32>, vector<8x8x8xf32>, vector<8x8x8xf32> -> vector<8x8x8xf32>
    "tpu.trace_stop"() : () -> ()
    %64 = vector.extract_strided_slice %63 {offsets = [0, 0, 0], sizes = [2, 8, 8], strides = [1, 1, 1]} : vector<8x8x8xf32> to vector<2x8x8xf32>
    %65 = vector.shape_cast %64 : vector<2x8x8xf32> to vector<16x8xf32>
    %66 = vector.extract_strided_slice %63 {offsets = [2, 0, 0], sizes = [2, 8, 8], strides = [1, 1, 1]} : vector<8x8x8xf32> to vector<2x8x8xf32>
    %67 = vector.shape_cast %66 : vector<2x8x8xf32> to vector<16x8xf32>
    %68 = vector.extract_strided_slice %63 {offsets = [4, 0, 0], sizes = [2, 8, 8], strides = [1, 1, 1]} : vector<8x8x8xf32> to vector<2x8x8xf32>
    %69 = vector.shape_cast %68 : vector<2x8x8xf32> to vector<16x8xf32>
    %70 = vector.extract_strided_slice %63 {offsets = [6, 0, 0], sizes = [2, 8, 8], strides = [1, 1, 1]} : vector<8x8x8xf32> to vector<2x8x8xf32>
    %71 = vector.shape_cast %70 : vector<2x8x8xf32> to vector<16x8xf32>
    %72 = tpu.concatenate %65, %67, %69, %71 in 1 : vector<16x8xf32>, vector<16x8xf32>, vector<16x8xf32>, vector<16x8xf32> -> vector<16x32xf32>
    %c0_18 = arith.constant 0 : index
    %c0_19 = arith.constant 0 : index
    %c0_20 = arith.constant 0 : index
    %73 = vector.load %arg6[%c0_18, %c0_19, %c0_20] : memref<2x32x32xf32, #tpu.memory_space<vmem>>, vector<1x32x32xf32>
    %74 = vector.shape_cast %73 : vector<1x32x32xf32> to vector<32x32xf32>
    %cst_21 = arith.constant dense<0.000000e+00> : vector<16x32xf32>
    %75 = tpu.matmul %72, %74, %cst_21 {dimension_numbers = #tpu.dot_dimension_numbers<[1], [0], [0], [1], [0, 0, 1, 1], [], []>} : vector<16x32xf32>, vector<32x32xf32>, vector<16x32xf32> -> vector<16x32xf32>
    %c0_22 = arith.constant 0 : index
    %c0_23 = arith.constant 0 : index
    %c0_24 = arith.constant 0 : index
    %76 = vector.load %arg7[%c0_22, %c0_23, %c0_24] : memref<2x1x32xf32, #tpu.memory_space<vmem>>, vector<1x1x32xf32>
    %77 = vector.shape_cast %76 : vector<1x1x32xf32> to vector<1x32xf32>
    %78 = vector.broadcast %77 : vector<1x32xf32> to vector<16x32xf32>
    %79 = arith.addf %75, %78 : vector<16x32xf32>
    %80 = arith.addf %15, %79 : vector<16x32xf32>
    %c0_25 = arith.constant 0 : index
    %c0_26 = arith.constant 0 : index
    %c0_27 = arith.constant 0 : index
    %81 = vector.load %arg8[%c0_25, %c0_26, %c0_27] : memref<2x1x32xf32, #tpu.memory_space<vmem>>, vector<1x1x32xf32>
    %82 = vector.shape_cast %81 : vector<1x1x32xf32> to vector<1x32xf32>
    %c0_28 = arith.constant 0 : index
    %c0_29 = arith.constant 0 : index
    %c0_30 = arith.constant 0 : index
    %83 = vector.load %arg9[%c0_28, %c0_29, %c0_30] : memref<2x1x32xf32, #tpu.memory_space<vmem>>, vector<1x1x32xf32>
    %84 = vector.shape_cast %83 : vector<1x1x32xf32> to vector<1x32xf32>
    %cst_31 = arith.constant dense<0.000000e+00> : vector<16xf32>
    %85 = vector.multi_reduction <add>, %80, %cst_31 [1] : vector<16x32xf32> to vector<16xf32>
    %86 = vector.shape_cast %85 : vector<16xf32> to vector<16x1xf32>
    %cst_32 = arith.constant 3.200000e+01 : f32
    %87 = vector.broadcast %cst_32 : f32 to vector<16x1xf32>
    %88 = arith.divf %86, %87 : vector<16x1xf32>
    %89 = vector.broadcast %88 : vector<16x1xf32> to vector<16x32xf32>
    %90 = arith.subf %80, %89 : vector<16x32xf32>
    %91 = arith.mulf %90, %90 : vector<16x32xf32>
    %cst_33 = arith.constant dense<0.000000e+00> : vector<16xf32>
    %92 = vector.multi_reduction <add>, %91, %cst_33 [1] : vector<16x32xf32> to vector<16xf32>
    %93 = vector.shape_cast %92 : vector<16xf32> to vector<16x1xf32>
    %cst_34 = arith.constant 3.200000e+01 : f32
    %94 = vector.broadcast %cst_34 : f32 to vector<16x1xf32>
    %95 = arith.divf %93, %94 : vector<16x1xf32>
    %96 = vector.broadcast %88 : vector<16x1xf32> to vector<16x32xf32>
    %97 = arith.subf %80, %96 : vector<16x32xf32>
    %cst_35 = arith.constant 9.99999974E-6 : f32
    %98 = vector.broadcast %cst_35 : f32 to vector<16x1xf32>
    %99 = arith.addf %95, %98 : vector<16x1xf32>
    %100 = math.rsqrt %99 : vector<16x1xf32>
    %101 = vector.broadcast %100 : vector<16x1xf32> to vector<16x32xf32>
    %102 = arith.mulf %97, %101 : vector<16x32xf32>
    %103 = vector.broadcast %82 : vector<1x32xf32> to vector<16x32xf32>
    %104 = arith.mulf %102, %103 : vector<16x32xf32>
    %105 = vector.broadcast %84 : vector<1x32xf32> to vector<16x32xf32>
    %106 = arith.addf %104, %105 : vector<16x32xf32>
    %c0_36 = arith.constant 0 : index
    %c0_37 = arith.constant 0 : index
    %c0_38 = arith.constant 0 : index
    %107 = vector.load %arg10[%c0_36, %c0_37, %c0_38] : memref<2x32x64xf32, #tpu.memory_space<vmem>>, vector<1x32x64xf32>
    %108 = vector.shape_cast %107 : vector<1x32x64xf32> to vector<32x64xf32>
    %cst_39 = arith.constant dense<0.000000e+00> : vector<16x64xf32>
    %109 = tpu.matmul %106, %108, %cst_39 {dimension_numbers = #tpu.dot_dimension_numbers<[1], [0], [0], [1], [0, 0, 1, 1], [], []>} : vector<16x32xf32>, vector<32x64xf32>, vector<16x64xf32> -> vector<16x64xf32>
    %c0_40 = arith.constant 0 : index
    %c0_41 = arith.constant 0 : index
    %c0_42 = arith.constant 0 : index
    %110 = vector.load %arg11[%c0_40, %c0_41, %c0_42] : memref<2x1x64xf32, #tpu.memory_space<vmem>>, vector<1x1x64xf32>
    %111 = vector.shape_cast %110 : vector<1x1x64xf32> to vector<1x64xf32>
    %112 = vector.broadcast %111 : vector<1x64xf32> to vector<16x64xf32>
    %113 = arith.addf %109, %112 : vector<16x64xf32>
    %cst_43 = arith.constant 0.000000e+00 : f32
    %114 = vector.broadcast %cst_43 : f32 to vector<16x64xf32>
    %115 = arith.maximumf %113, %114 : vector<16x64xf32>
    %c0_44 = arith.constant 0 : index
    %c0_45 = arith.constant 0 : index
    %c0_46 = arith.constant 0 : index
    %116 = vector.load %arg12[%c0_44, %c0_45, %c0_46] : memref<2x64x32xf32, #tpu.memory_space<vmem>>, vector<1x64x32xf32>
    %117 = vector.shape_cast %116 : vector<1x64x32xf32> to vector<64x32xf32>
    %cst_47 = arith.constant dense<0.000000e+00> : vector<16x32xf32>
    %118 = tpu.matmul %115, %117, %cst_47 {dimension_numbers = #tpu.dot_dimension_numbers<[1], [0], [0], [1], [0, 0, 1, 1], [], []>} : vector<16x64xf32>, vector<64x32xf32>, vector<16x32xf32> -> vector<16x32xf32>
    %c0_48 = arith.constant 0 : index
    %c0_49 = arith.constant 0 : index
    %c0_50 = arith.constant 0 : index
    %119 = vector.load %arg13[%c0_48, %c0_49, %c0_50] : memref<2x1x32xf32, #tpu.memory_space<vmem>>, vector<1x1x32xf32>
    %120 = vector.shape_cast %119 : vector<1x1x32xf32> to vector<1x32xf32>
    %121 = vector.broadcast %120 : vector<1x32xf32> to vector<16x32xf32>
    %122 = arith.addf %118, %121 : vector<16x32xf32>
    %123 = arith.addf %106, %122 : vector<16x32xf32>
    %c0_51 = arith.constant 0 : index
    %c0_52 = arith.constant 0 : index
    %c0_53 = arith.constant 0 : index
    %124 = vector.load %arg14[%c0_51, %c0_52, %c0_53] : memref<2x1x32xf32, #tpu.memory_space<vmem>>, vector<1x1x32xf32>
    %125 = vector.shape_cast %124 : vector<1x1x32xf32> to vector<1x32xf32>
    %c0_54 = arith.constant 0 : index
    %c0_55 = arith.constant 0 : index
    %c0_56 = arith.constant 0 : index
    %126 = vector.load %arg15[%c0_54, %c0_55, %c0_56] : memref<2x1x32xf32, #tpu.memory_space<vmem>>, vector<1x1x32xf32>
    %127 = vector.shape_cast %126 : vector<1x1x32xf32> to vector<1x32xf32>
    %cst_57 = arith.constant dense<0.000000e+00> : vector<16xf32>
    %128 = vector.multi_reduction <add>, %123, %cst_57 [1] : vector<16x32xf32> to vector<16xf32>
    %129 = vector.shape_cast %128 : vector<16xf32> to vector<16x1xf32>
    %cst_58 = arith.constant 3.200000e+01 : f32
    %130 = vector.broadcast %cst_58 : f32 to vector<16x1xf32>
    %131 = arith.divf %129, %130 : vector<16x1xf32>
    %132 = vector.broadcast %131 : vector<16x1xf32> to vector<16x32xf32>
    %133 = arith.subf %123, %132 : vector<16x32xf32>
    %134 = arith.mulf %133, %133 : vector<16x32xf32>
    %cst_59 = arith.constant dense<0.000000e+00> : vector<16xf32>
    %135 = vector.multi_reduction <add>, %134, %cst_59 [1] : vector<16x32xf32> to vector<16xf32>
    %136 = vector.shape_cast %135 : vector<16xf32> to vector<16x1xf32>
    %cst_60 = arith.constant 3.200000e+01 : f32
    %137 = vector.broadcast %cst_60 : f32 to vector<16x1xf32>
    %138 = arith.divf %136, %137 : vector<16x1xf32>
    %139 = vector.broadcast %131 : vector<16x1xf32> to vector<16x32xf32>
    %140 = arith.subf %123, %139 : vector<16x32xf32>
    %cst_61 = arith.constant 9.99999974E-6 : f32
    %141 = vector.broadcast %cst_61 : f32 to vector<16x1xf32>
    %142 = arith.addf %138, %141 : vector<16x1xf32>
    %143 = math.rsqrt %142 : vector<16x1xf32>
    %144 = vector.broadcast %143 : vector<16x1xf32> to vector<16x32xf32>
    %145 = arith.mulf %140, %144 : vector<16x32xf32>
    %146 = vector.broadcast %125 : vector<1x32xf32> to vector<16x32xf32>
    %147 = arith.mulf %145, %146 : vector<16x32xf32>
    %148 = vector.broadcast %127 : vector<1x32xf32> to vector<16x32xf32>
    %149 = arith.addf %147, %148 : vector<16x32xf32>
    %c1 = arith.constant 1 : index
    %c0_62 = arith.constant 0 : index
    %c0_63 = arith.constant 0 : index
    %150 = vector.load %arg4[%c1, %c0_62, %c0_63] : memref<2x32x96xf32, #tpu.memory_space<vmem>>, vector<1x32x96xf32>
    %151 = vector.shape_cast %150 : vector<1x32x96xf32> to vector<32x96xf32>
    %cst_64 = arith.constant dense<0.000000e+00> : vector<16x96xf32>
    %152 = tpu.matmul %149, %151, %cst_64 {dimension_numbers = #tpu.dot_dimension_numbers<[1], [0], [0], [1], [0, 0, 1, 1], [], []>} : vector<16x32xf32>, vector<32x96xf32>, vector<16x96xf32> -> vector<16x96xf32>
    %c1_65 = arith.constant 1 : index
    %c0_66 = arith.constant 0 : index
    %c0_67 = arith.constant 0 : index
    %153 = vector.load %arg5[%c1_65, %c0_66, %c0_67] : memref<2x1x96xf32, #tpu.memory_space<vmem>>, vector<1x1x96xf32>
    %154 = vector.shape_cast %153 : vector<1x1x96xf32> to vector<1x96xf32>
    %155 = vector.broadcast %154 : vector<1x96xf32> to vector<16x96xf32>
    %156 = arith.addf %152, %155 : vector<16x96xf32>
    %157 = vector.extract_strided_slice %156 {offsets = [0, 0], sizes = [16, 8], strides = [1, 1]} : vector<16x96xf32> to vector<16x8xf32>
    %158 = vector.shape_cast %157 : vector<16x8xf32> to vector<2x8x8xf32>
    %159 = vector.extract_strided_slice %156 {offsets = [0, 8], sizes = [16, 8], strides = [1, 1]} : vector<16x96xf32> to vector<16x8xf32>
    %160 = vector.shape_cast %159 : vector<16x8xf32> to vector<2x8x8xf32>
    %161 = vector.extract_strided_slice %156 {offsets = [0, 16], sizes = [16, 8], strides = [1, 1]} : vector<16x96xf32> to vector<16x8xf32>
    %162 = vector.shape_cast %161 : vector<16x8xf32> to vector<2x8x8xf32>
    %163 = vector.extract_strided_slice %156 {offsets = [0, 24], sizes = [16, 8], strides = [1, 1]} : vector<16x96xf32> to vector<16x8xf32>
    %164 = vector.shape_cast %163 : vector<16x8xf32> to vector<2x8x8xf32>
    %165 = tpu.concatenate %158, %160, %162, %164 in 0 : vector<2x8x8xf32>, vector<2x8x8xf32>, vector<2x8x8xf32>, vector<2x8x8xf32> -> vector<8x8x8xf32>
    %166 = vector.extract_strided_slice %156 {offsets = [0, 32], sizes = [16, 8], strides = [1, 1]} : vector<16x96xf32> to vector<16x8xf32>
    %167 = vector.shape_cast %166 : vector<16x8xf32> to vector<2x8x8xf32>
    %168 = vector.extract_strided_slice %156 {offsets = [0, 40], sizes = [16, 8], strides = [1, 1]} : vector<16x96xf32> to vector<16x8xf32>
    %169 = vector.shape_cast %168 : vector<16x8xf32> to vector<2x8x8xf32>
    %170 = vector.extract_strided_slice %156 {offsets = [0, 48], sizes = [16, 8], strides = [1, 1]} : vector<16x96xf32> to vector<16x8xf32>
    %171 = vector.shape_cast %170 : vector<16x8xf32> to vector<2x8x8xf32>
    %172 = vector.extract_strided_slice %156 {offsets = [0, 56], sizes = [16, 8], strides = [1, 1]} : vector<16x96xf32> to vector<16x8xf32>
    %173 = vector.shape_cast %172 : vector<16x8xf32> to vector<2x8x8xf32>
    %174 = tpu.concatenate %167, %169, %171, %173 in 0 : vector<2x8x8xf32>, vector<2x8x8xf32>, vector<2x8x8xf32>, vector<2x8x8xf32> -> vector<8x8x8xf32>
    %175 = vector.extract_strided_slice %156 {offsets = [0, 64], sizes = [16, 8], strides = [1, 1]} : vector<16x96xf32> to vector<16x8xf32>
    %176 = vector.shape_cast %175 : vector<16x8xf32> to vector<2x8x8xf32>
    %177 = vector.extract_strided_slice %156 {offsets = [0, 72], sizes = [16, 8], strides = [1, 1]} : vector<16x96xf32> to vector<16x8xf32>
    %178 = vector.shape_cast %177 : vector<16x8xf32> to vector<2x8x8xf32>
    %179 = vector.extract_strided_slice %156 {offsets = [0, 80], sizes = [16, 8], strides = [1, 1]} : vector<16x96xf32> to vector<16x8xf32>
    %180 = vector.shape_cast %179 : vector<16x8xf32> to vector<2x8x8xf32>
    %181 = vector.extract_strided_slice %156 {offsets = [0, 88], sizes = [16, 8], strides = [1, 1]} : vector<16x96xf32> to vector<16x8xf32>
    %182 = vector.shape_cast %181 : vector<16x8xf32> to vector<2x8x8xf32>
    %183 = tpu.concatenate %176, %178, %180, %182 in 0 : vector<2x8x8xf32>, vector<2x8x8xf32>, vector<2x8x8xf32>, vector<2x8x8xf32> -> vector<8x8x8xf32>
    "tpu.trace_start"() <{level = 10 : i32, message = "gqd,gkd->gqk"}> : () -> ()
    %cst_68 = arith.constant dense<0.000000e+00> : vector<8x8x8xf32>
    %184 = tpu.matmul %165, %174, %cst_68 {dimension_numbers = #tpu.dot_dimension_numbers<[2], [2], [1], [1], [0, 0, 0, 1, 1, 1], [0], [0]>} : vector<8x8x8xf32>, vector<8x8x8xf32>, vector<8x8x8xf32> -> vector<8x8x8xf32>
    "tpu.trace_stop"() : () -> ()
    %cst_69 = arith.constant 0.353553385 : f32
    %185 = vector.broadcast %cst_69 : f32 to vector<8x8x8xf32>
    %186 = arith.mulf %184, %185 : vector<8x8x8xf32>
    %cst_70 = arith.constant dense<0xFF800000> : vector<8x8xf32>
    %187 = vector.multi_reduction <maximumf>, %186, %cst_70 [2] : vector<8x8x8xf32> to vector<8x8xf32>
    %188 = vector.shape_cast %187 : vector<8x8xf32> to vector<8x8x1xf32>
    %189 = vector.broadcast %188 : vector<8x8x1xf32> to vector<8x8x8xf32>
    %190 = arith.subf %186, %189 : vector<8x8x8xf32>
    %191 = math.exp %190 : vector<8x8x8xf32>
    %cst_71 = arith.constant dense<0.000000e+00> : vector<8x8xf32>
    %192 = vector.multi_reduction <add>, %191, %cst_71 [2] : vector<8x8x8xf32> to vector<8x8xf32>
    %193 = vector.shape_cast %192 : vector<8x8xf32> to vector<8x8x1xf32>
    %194 = tpu.reciprocal %193 {approx = true} : vector<8x8x1xf32> -> vector<8x8x1xf32>
    %195 = vector.broadcast %194 : vector<8x8x1xf32> to vector<8x8x8xf32>
    %196 = arith.mulf %191, %195 : vector<8x8x8xf32>
    "tpu.trace_start"() <{level = 10 : i32, message = "gqk,gkd->gqd"}> : () -> ()
    %cst_72 = arith.constant dense<0.000000e+00> : vector<8x8x8xf32>
    %197 = tpu.matmul %196, %183, %cst_72 {dimension_numbers = #tpu.dot_dimension_numbers<[2], [1], [1], [2], [0, 0, 0, 1, 1, 2], [0], [0]>} : vector<8x8x8xf32>, vector<8x8x8xf32>, vector<8x8x8xf32> -> vector<8x8x8xf32>
    "tpu.trace_stop"() : () -> ()
    %198 = vector.extract_strided_slice %197 {offsets = [0, 0, 0], sizes = [2, 8, 8], strides = [1, 1, 1]} : vector<8x8x8xf32> to vector<2x8x8xf32>
    %199 = vector.shape_cast %198 : vector<2x8x8xf32> to vector<16x8xf32>
    %200 = vector.extract_strided_slice %197 {offsets = [2, 0, 0], sizes = [2, 8, 8], strides = [1, 1, 1]} : vector<8x8x8xf32> to vector<2x8x8xf32>
    %201 = vector.shape_cast %200 : vector<2x8x8xf32> to vector<16x8xf32>
    %202 = vector.extract_strided_slice %197 {offsets = [4, 0, 0], sizes = [2, 8, 8], strides = [1, 1, 1]} : vector<8x8x8xf32> to vector<2x8x8xf32>
    %203 = vector.shape_cast %202 : vector<2x8x8xf32> to vector<16x8xf32>
    %204 = vector.extract_strided_slice %197 {offsets = [6, 0, 0], sizes = [2, 8, 8], strides = [1, 1, 1]} : vector<8x8x8xf32> to vector<2x8x8xf32>
    %205 = vector.shape_cast %204 : vector<2x8x8xf32> to vector<16x8xf32>
    %206 = tpu.concatenate %199, %201, %203, %205 in 1 : vector<16x8xf32>, vector<16x8xf32>, vector<16x8xf32>, vector<16x8xf32> -> vector<16x32xf32>
    %c1_73 = arith.constant 1 : index
    %c0_74 = arith.constant 0 : index
    %c0_75 = arith.constant 0 : index
    %207 = vector.load %arg6[%c1_73, %c0_74, %c0_75] : memref<2x32x32xf32, #tpu.memory_space<vmem>>, vector<1x32x32xf32>
    %208 = vector.shape_cast %207 : vector<1x32x32xf32> to vector<32x32xf32>
    %cst_76 = arith.constant dense<0.000000e+00> : vector<16x32xf32>
    %209 = tpu.matmul %206, %208, %cst_76 {dimension_numbers = #tpu.dot_dimension_numbers<[1], [0], [0], [1], [0, 0, 1, 1], [], []>} : vector<16x32xf32>, vector<32x32xf32>, vector<16x32xf32> -> vector<16x32xf32>
    %c1_77 = arith.constant 1 : index
    %c0_78 = arith.constant 0 : index
    %c0_79 = arith.constant 0 : index
    %210 = vector.load %arg7[%c1_77, %c0_78, %c0_79] : memref<2x1x32xf32, #tpu.memory_space<vmem>>, vector<1x1x32xf32>
    %211 = vector.shape_cast %210 : vector<1x1x32xf32> to vector<1x32xf32>
    %212 = vector.broadcast %211 : vector<1x32xf32> to vector<16x32xf32>
    %213 = arith.addf %209, %212 : vector<16x32xf32>
    %214 = arith.addf %149, %213 : vector<16x32xf32>
    %c1_80 = arith.constant 1 : index
    %c0_81 = arith.constant 0 : index
    %c0_82 = arith.constant 0 : index
    %215 = vector.load %arg8[%c1_80, %c0_81, %c0_82] : memref<2x1x32xf32, #tpu.memory_space<vmem>>, vector<1x1x32xf32>
    %216 = vector.shape_cast %215 : vector<1x1x32xf32> to vector<1x32xf32>
    %c1_83 = arith.constant 1 : index
    %c0_84 = arith.constant 0 : index
    %c0_85 = arith.constant 0 : index
    %217 = vector.load %arg9[%c1_83, %c0_84, %c0_85] : memref<2x1x32xf32, #tpu.memory_space<vmem>>, vector<1x1x32xf32>
    %218 = vector.shape_cast %217 : vector<1x1x32xf32> to vector<1x32xf32>
    %cst_86 = arith.constant dense<0.000000e+00> : vector<16xf32>
    %219 = vector.multi_reduction <add>, %214, %cst_86 [1] : vector<16x32xf32> to vector<16xf32>
    %220 = vector.shape_cast %219 : vector<16xf32> to vector<16x1xf32>
    %cst_87 = arith.constant 3.200000e+01 : f32
    %221 = vector.broadcast %cst_87 : f32 to vector<16x1xf32>
    %222 = arith.divf %220, %221 : vector<16x1xf32>
    %223 = vector.broadcast %222 : vector<16x1xf32> to vector<16x32xf32>
    %224 = arith.subf %214, %223 : vector<16x32xf32>
    %225 = arith.mulf %224, %224 : vector<16x32xf32>
    %cst_88 = arith.constant dense<0.000000e+00> : vector<16xf32>
    %226 = vector.multi_reduction <add>, %225, %cst_88 [1] : vector<16x32xf32> to vector<16xf32>
    %227 = vector.shape_cast %226 : vector<16xf32> to vector<16x1xf32>
    %cst_89 = arith.constant 3.200000e+01 : f32
    %228 = vector.broadcast %cst_89 : f32 to vector<16x1xf32>
    %229 = arith.divf %227, %228 : vector<16x1xf32>
    %230 = vector.broadcast %222 : vector<16x1xf32> to vector<16x32xf32>
    %231 = arith.subf %214, %230 : vector<16x32xf32>
    %cst_90 = arith.constant 9.99999974E-6 : f32
    %232 = vector.broadcast %cst_90 : f32 to vector<16x1xf32>
    %233 = arith.addf %229, %232 : vector<16x1xf32>
    %234 = math.rsqrt %233 : vector<16x1xf32>
    %235 = vector.broadcast %234 : vector<16x1xf32> to vector<16x32xf32>
    %236 = arith.mulf %231, %235 : vector<16x32xf32>
    %237 = vector.broadcast %216 : vector<1x32xf32> to vector<16x32xf32>
    %238 = arith.mulf %236, %237 : vector<16x32xf32>
    %239 = vector.broadcast %218 : vector<1x32xf32> to vector<16x32xf32>
    %240 = arith.addf %238, %239 : vector<16x32xf32>
    %c1_91 = arith.constant 1 : index
    %c0_92 = arith.constant 0 : index
    %c0_93 = arith.constant 0 : index
    %241 = vector.load %arg10[%c1_91, %c0_92, %c0_93] : memref<2x32x64xf32, #tpu.memory_space<vmem>>, vector<1x32x64xf32>
    %242 = vector.shape_cast %241 : vector<1x32x64xf32> to vector<32x64xf32>
    %cst_94 = arith.constant dense<0.000000e+00> : vector<16x64xf32>
    %243 = tpu.matmul %240, %242, %cst_94 {dimension_numbers = #tpu.dot_dimension_numbers<[1], [0], [0], [1], [0, 0, 1, 1], [], []>} : vector<16x32xf32>, vector<32x64xf32>, vector<16x64xf32> -> vector<16x64xf32>
    %c1_95 = arith.constant 1 : index
    %c0_96 = arith.constant 0 : index
    %c0_97 = arith.constant 0 : index
    %244 = vector.load %arg11[%c1_95, %c0_96, %c0_97] : memref<2x1x64xf32, #tpu.memory_space<vmem>>, vector<1x1x64xf32>
    %245 = vector.shape_cast %244 : vector<1x1x64xf32> to vector<1x64xf32>
    %246 = vector.broadcast %245 : vector<1x64xf32> to vector<16x64xf32>
    %247 = arith.addf %243, %246 : vector<16x64xf32>
    %cst_98 = arith.constant 0.000000e+00 : f32
    %248 = vector.broadcast %cst_98 : f32 to vector<16x64xf32>
    %249 = arith.maximumf %247, %248 : vector<16x64xf32>
    %c1_99 = arith.constant 1 : index
    %c0_100 = arith.constant 0 : index
    %c0_101 = arith.constant 0 : index
    %250 = vector.load %arg12[%c1_99, %c0_100, %c0_101] : memref<2x64x32xf32, #tpu.memory_space<vmem>>, vector<1x64x32xf32>
    %251 = vector.shape_cast %250 : vector<1x64x32xf32> to vector<64x32xf32>
    %cst_102 = arith.constant dense<0.000000e+00> : vector<16x32xf32>
    %252 = tpu.matmul %249, %251, %cst_102 {dimension_numbers = #tpu.dot_dimension_numbers<[1], [0], [0], [1], [0, 0, 1, 1], [], []>} : vector<16x64xf32>, vector<64x32xf32>, vector<16x32xf32> -> vector<16x32xf32>
    %c1_103 = arith.constant 1 : index
    %c0_104 = arith.constant 0 : index
    %c0_105 = arith.constant 0 : index
    %253 = vector.load %arg13[%c1_103, %c0_104, %c0_105] : memref<2x1x32xf32, #tpu.memory_space<vmem>>, vector<1x1x32xf32>
    %254 = vector.shape_cast %253 : vector<1x1x32xf32> to vector<1x32xf32>
    %255 = vector.broadcast %254 : vector<1x32xf32> to vector<16x32xf32>
    %256 = arith.addf %252, %255 : vector<16x32xf32>
    %257 = arith.addf %240, %256 : vector<16x32xf32>
    %c1_106 = arith.constant 1 : index
    %c0_107 = arith.constant 0 : index
    %c0_108 = arith.constant 0 : index
    %258 = vector.load %arg14[%c1_106, %c0_107, %c0_108] : memref<2x1x32xf32, #tpu.memory_space<vmem>>, vector<1x1x32xf32>
    %259 = vector.shape_cast %258 : vector<1x1x32xf32> to vector<1x32xf32>
    %c1_109 = arith.constant 1 : index
    %c0_110 = arith.constant 0 : index
    %c0_111 = arith.constant 0 : index
    %260 = vector.load %arg15[%c1_109, %c0_110, %c0_111] : memref<2x1x32xf32, #tpu.memory_space<vmem>>, vector<1x1x32xf32>
    %261 = vector.shape_cast %260 : vector<1x1x32xf32> to vector<1x32xf32>
    %cst_112 = arith.constant dense<0.000000e+00> : vector<16xf32>
    %262 = vector.multi_reduction <add>, %257, %cst_112 [1] : vector<16x32xf32> to vector<16xf32>
    %263 = vector.shape_cast %262 : vector<16xf32> to vector<16x1xf32>
    %cst_113 = arith.constant 3.200000e+01 : f32
    %264 = vector.broadcast %cst_113 : f32 to vector<16x1xf32>
    %265 = arith.divf %263, %264 : vector<16x1xf32>
    %266 = vector.broadcast %265 : vector<16x1xf32> to vector<16x32xf32>
    %267 = arith.subf %257, %266 : vector<16x32xf32>
    %268 = arith.mulf %267, %267 : vector<16x32xf32>
    %cst_114 = arith.constant dense<0.000000e+00> : vector<16xf32>
    %269 = vector.multi_reduction <add>, %268, %cst_114 [1] : vector<16x32xf32> to vector<16xf32>
    %270 = vector.shape_cast %269 : vector<16xf32> to vector<16x1xf32>
    %cst_115 = arith.constant 3.200000e+01 : f32
    %271 = vector.broadcast %cst_115 : f32 to vector<16x1xf32>
    %272 = arith.divf %270, %271 : vector<16x1xf32>
    %273 = vector.broadcast %265 : vector<16x1xf32> to vector<16x32xf32>
    %274 = arith.subf %257, %273 : vector<16x32xf32>
    %cst_116 = arith.constant 9.99999974E-6 : f32
    %275 = vector.broadcast %cst_116 : f32 to vector<16x1xf32>
    %276 = arith.addf %272, %275 : vector<16x1xf32>
    %277 = math.rsqrt %276 : vector<16x1xf32>
    %278 = vector.broadcast %277 : vector<16x1xf32> to vector<16x32xf32>
    %279 = arith.mulf %274, %278 : vector<16x32xf32>
    %280 = vector.broadcast %259 : vector<1x32xf32> to vector<16x32xf32>
    %281 = arith.mulf %279, %280 : vector<16x32xf32>
    %282 = vector.broadcast %261 : vector<1x32xf32> to vector<16x32xf32>
    %283 = arith.addf %281, %282 : vector<16x32xf32>
    %284 = vector.shape_cast %283 : vector<16x32xf32> to vector<2x8x32xf32>
    %cst_117 = arith.constant dense<0.000000e+00> : vector<2x32xf32>
    %285 = vector.multi_reduction <add>, %284, %cst_117 [1] : vector<2x8x32xf32> to vector<2x32xf32>
    %cst_118 = arith.constant 8.000000e+00 : f32
    %286 = vector.broadcast %cst_118 : f32 to vector<2x32xf32>
    %287 = arith.divf %285, %286 : vector<2x32xf32>
    %c0_119 = arith.constant 0 : index
    %c0_120 = arith.constant 0 : index
    %288 = vector.load %arg16[%c0_119, %c0_120] : memref<2x32xf32, #tpu.memory_space<vmem>>, vector<2x32xf32>
    tpu.vector_store %arg16[%c0_119, %c0_120], %287 {strides = array<i32>} : memref<2x32xf32, #tpu.memory_space<vmem>>, vector<2x32xf32>,
    return
  }
}

</mosaic_0001>

<bundles_post_ra>
// kernel: tpu_custom_call.1
= control target key start
LH: loop header
LB: loop body
LE: loop exit
PB: predicated region body
PF: predicated region fallthrough
CT: control target
= control target key end

     0   :  { %s5321_s0 = inlined_call_operand.hbm [shape: f32[2,8], index: 0, kind: input, shape index: {}]   ;;  %s5322_s1 = inlined_call_operand.hbm [shape: f32[1,32], index: 1, kind: input, shape index: {}]   ;;  %s5323_s2 = inlined_call_operand.hbm [shape: f32[1,32], index: 2, kind: input, shape index: {}]   ;;  %s5324_s3 = inlined_call_operand.vmem [shape: f32[8,32], index: 3, kind: input, shape index: {}]   ;;  %s5325_s4 = inlined_call_operand.vmem [shape: f32[2,32,96], index: 4, kind: input, shape index: {}]   ;;  %s5326_s5 = inlined_call_operand.vmem [shape: f32[2,1,96], index: 5, kind: input, shape index: {}]   ;;  %s5327_s6 = inlined_call_operand.vmem [shape: f32[2,32,32], index: 6, kind: input, shape index: {}]   ;;  %s5328_s7 = inlined_call_operand.vmem [shape: f32[2,1,32], index: 7, kind: input, shape index: {}]   ;;  %s5329_s8 = inlined_call_operand.vmem [shape: f32[2,1,32], index: 8, kind: input, shape index: {}]   ;;  %s5330_s9 = inlined_call_operand.vmem [shape: f32[2,1,32], index: 9, kind: input, shape index: {}]   ;;  %s5331_s10 = inlined_call_operand.vmem [shape: f32[2,32,64], index: 10, kind: input, shape index: {}]   ;;  %s5332_s11 = inlined_call_operand.vmem [shape: f32[2,1,64], index: 11, kind: input, shape index: {}]   ;;  %s5333_s12 = inlined_call_operand.vmem [shape: f32[2,64,32], index: 12, kind: input, shape index: {}]   ;;  %s5334_s13 = inlined_call_operand.vmem [shape: f32[2,1,32], index: 13, kind: input, shape index: {}]   ;;  %s5335_s14 = inlined_call_operand.vmem [shape: f32[2,1,32], index: 14, kind: input, shape index: {}]   ;;  %s5336_s15 = inlined_call_operand.vmem [shape: f32[2,1,32], index: 15, kind: input, shape index: {}]   ;;  %s5337_s16 = inlined_call_operand.hbm [shape: f32[2,32], index: 16, kind: output, shape index: {}]  }
   0x1   :  { %5339 = sst [smem:[#allocation12_spill]] %s5321_s0 }
   0x2   :  { %21 = vsyncpa [#allocation3], 0 }
   0x3   :  { %22 = vsyncpa [#allocation6], 0 }
   0x4   :  { %23 = vsyncpa [#allocation4], 0  ;;  %s4589_s21 = smov [#allocation5]   ;;  %s4590_s23 = smov [#allocation2]  }
   0x5   :  { %s40_s22 = sshll.u32 %s4589_s21, 4  ;;  %s30_s24 = sshll.u32 %s4590_s23, 4  ;;  %s41_s22 = int_to_ptr.vmem [resolvable:$true] %s40_s22  ;;  %s31_s24 = int_to_ptr.vmem [resolvable:$true] %s30_s24 }
   0x6   :  { %s4495_s27 = scalar_lea.hbm %s5322_s1, 16 }
   0x7   :  { %p4496_p0 = scmp.ne.s32.totalorder %s5322_s1, %s4495_s27  ;;  %p4499_p1 = scmp.lt.u32.totalorder %s4495_s27, %s5322_s1 }
   0x9   :  { %p4501_p2 = pnand %p4499_p1, %p4496_p0 }
   0xb   :  { %4504 = shalt.err (!%p4501_p2)
}
   0xc   :  { %s4505_s17 = scalar_lea.vmem %s41_s22, 16  ;;  %s4509_s18 = scalar_lea.vmem %s41_s22, 32 }
   0xd   :  { %p4506_p3 = scmp.ne.s32.totalorder %s41_s22, %s4505_s17  ;;  %p4510_p4 = scmp.lt.s32.totalorder %s41_s22, %s41_s22 }
   0xe   :  { %p4511_p5 = scmp.lt.s32.totalorder %s4509_s18, %s4505_s17 }
  0x10   :  { %p4512_p6 = por %p4511_p5, %p4510_p4 }
  0x12   :  { %p4513_p7 = pnand %p4512_p6, %p4506_p3 }
  0x14   :  { %4516 = shalt.err (!%p4513_p7)
}
  0x15   :  { %43 = dma.hbm_to_vmem [thread:$0]  %s5322_s1, 16, %s41_s22, [#allocation6]  }
  0x16   :  { %s5340_s25 = sld [smem:[#allocation12_spill]] }
  0x1c   :  { %s4517_s26 = scalar_lea.hbm %s5340_s25, 32 }
  0x1d   :  { %p4518_p8 = scmp.ne.s32.totalorder %s5340_s25, %s4517_s26  ;;  %p4521_p9 = scmp.lt.u32.totalorder %s4517_s26, %s5340_s25 }
  0x1f   :  { %p4523_p10 = pnand %p4521_p9, %p4518_p8 }
  0x21   :  { %4526 = shalt.err (!%p4523_p10)
}
  0x22   :  { %s4527_s0 = scalar_lea.vmem %s31_s24, 32  ;;  %p4532_p12 = scmp.lt.s32.totalorder %s31_s24, %s31_s24 }
  0x23   :  { %p4528_p11 = scmp.ne.s32.totalorder %s31_s24, %s4527_s0  ;;  %p4533_p13 = scmp.lt.s32.totalorder %s4527_s0, %s4527_s0 }
  0x25   :  { %p4534_p0 = por %p4533_p13, %p4532_p12 }
  0x27   :  { %p4535_p1 = pnand %p4534_p0, %p4528_p11 }
  0x29   :  { %4538 = shalt.err (!%p4535_p1)
}
  0x2a   :  { %33 = dma.hbm_to_vmem [thread:$0]  %s5340_s25, 32, %s31_s24, [#allocation3]  }
  0x2b   :  { %s4591_s17 = smov [#allocation7]   ;;  %s4539_s21 = scalar_lea.hbm %s5323_s2, 16 }
  0x2c   :  { %s50_s18 = sshll.u32 %s4591_s17, 4  ;;  %p4540_p2 = scmp.ne.s32.totalorder %s5323_s2, %s4539_s21  ;;  %s51_s18 = int_to_ptr.vmem [resolvable:$true] %s50_s18 }
  0x2d   :  { %p4543_p3 = scmp.lt.u32.totalorder %s4539_s21, %s5323_s2 }
  0x2f   :  { %p4545_p4 = pnand %p4543_p3, %p4540_p2 }
  0x31   :  { %4548 = shalt.err (!%p4545_p4)
}
  0x32   :  { %s4549_s29 = scalar_lea.vmem %s51_s18, 16  ;;  %s4553_s24 = scalar_lea.vmem %s51_s18, 32 }
  0x33   :  { %p4550_p5 = scmp.ne.s32.totalorder %s51_s18, %s4549_s29  ;;  %p4554_p6 = scmp.lt.s32.totalorder %s51_s18, %s51_s18 }
  0x34   :  { %p4555_p7 = scmp.lt.s32.totalorder %s4553_s24, %s4549_s29 }
  0x36   :  { %p4556_p8 = por %p4555_p7, %p4554_p6 }
  0x38   :  { %p4557_p9 = pnand %p4556_p8, %p4550_p5 }
  0x3a   :  { %4560 = shalt.err (!%p4557_p9)
}
  0x3b   :  { %53 = dma.hbm_to_vmem [thread:$0]  %s5323_s2, 16, %s51_s18, [#allocation6]  }
  0x3c   :  { %4583 = dma.done.wait [#allocation3], 32  }
  0x3d   :  { %4584 = vsyncadd [#allocation3], 4294967264 }
  0x3e   :  { %4585 = dma.done.wait [#allocation6], 32  }
  0x3f   :  { %4586 = vsyncadd [#allocation6], 4294967264  ;;  %v90_v0 = vlaneseq  ;;  %v89_v4 = vld [vmem:[#allocation2] sm:$0x3]  ;;  %v126_v7 = vld [vmem:[%s5325_s4 + $0x8] sm:$0xff]  ;;  %vm136_vm0 = vcmask 261120  }
  0x40   :  { %v125_v5 = vld [vmem:[%s5325_s4] sm:$0xff]  ;;  %v127_v8 = vld [vmem:[%s5325_s4 + $0x10] sm:$0xff]  ;;  %v128_v10 = vld [vmem:[%s5325_s4 + $0x18] sm:$0xff]  ;;  %v4592_v24 = vmov 0.0   ;;  %vm4593_vm1 = vmmov 0   ;;  %s4594_s28 = smov 112  }
  0x41   :  { %v91_v1 = vshrl.u32 %v90_v0, 7  ;;  %v4321_v9 = vpack.c.bf16 %v126_v7, %v125_v5  ;;  %v4325_v12 = vpack.c.bf16 %v128_v10, %v127_v8  ;;  %v3827_v13 = vld [vmem:[#allocation5] ss:$0 sm:$0xff]  ;;  %v3828_v15 = vld [vmem:[#allocation7] ss:$0 sm:$0xff]  ;;  %4078 = vmatprep.subr.mxu0 %v4592_v24  ;;  %4080 = vmatprep.mubr.msk.f32.mxu0 %vm4593_vm1, %v4592_v24  ;;  %s4595_s27 = smov 120  }
  0x42   :  { %v122_v17 = vld [vmem:[%s5324_s3] sm:$0xff]  ;;  %s4596_s29 = smov 104   ;;  %s4597_s24 = smov 96   ;;  %vm234_vm2 = vcmask 64512   ;;  %vm1571_vm3 = vcmask 130048   ;;  %vm1574_vm4 = vcmask 195584  }
  0x43   :  { %v92_v2 = vsub.s32 0, %v91_v1  ;;  %v99_v3 = vsub.s32 1, %v91_v1  ;;  %4322 = vmatprep.subr.bf16.mxu1 %v4321_v9  ;;  %v3829_v25 = vld [vmem:[%s5326_s5] ss:$0 sm:$0xff]  ;;  %s4598_s25 = smov 64   ;;  %s4599_s20 = smov 8  }
  0x44   :  { %4324 = vmatpush3.bf16.msra.mxu1 %v4321_v9  ;;  %s4600_s21 = smov 16   ;;  %s4601_s23 = smov 24   ;;  %vm1825_vm5 = vcmask 523264   ;;  %vm3806_vm6 = vcmask 1041409   ;;  %vm3809_vm7 = vcmask 254976  }
  0x45   :  { %v93_v6 = vrot.slane %v89_v4, %v92_v2  ;;  %v100_v11 = vrot.slane %v89_v4, %v99_v3  ;;  %4326 = vmatprep.subr.bf16.mxu1 %v4325_v12 }
  0x47   :  { %95 = vbcast.lane.b32.xlu0 %v93_v6, 256 }
  0x48   :  { %4328 = vmatpush3.bf16.msra.mxu1 %v4325_v12 }
  0x49   :  { %4068 = vmatprep.subr.mxu1 %v4592_v24 }
  0x4b   :  { %102 = vbcast.lane.b32.xlu0 %v100_v11, 256 }
  0xb9   :  { %v96_v14 = vpop.permute.xlu0 %95 }
  0xba   :  { %v111_v16 = vmul.f32 %v3827_v13, %v96_v14 }
  0xbc   :  { %v120_v18 = vadd.f32 %v3828_v15, %v111_v16 }
  0xbd   :  { %v103_v19 = vpop.permute.xlu0 %102 }
  0xbe   :  { %v112_v20 = vmul.f32 %v3827_v13, %v103_v19  ;;  %v4739_v21 = vadd.f32 %v122_v17, %v120_v18 }
  0xc0   :  { %v121_v22 = vadd.f32 %v3828_v15, %v112_v20  ;;  %4065 = vmatprep.mubr.msk.f32.mxu1 %vm136_vm0, %v4739_v21 }
  0xc2   :  { %v4743_v23 = vadd.f32 %v122_v17, %v121_v22 }
  0xc4   :  { %4066 = vmatmul.mubr.msk.f32.vlgmr.msra.gmra.mrb[0].mxu1 %vm136_vm0, %v4743_v23 }
  0xc5   :  { %4070 = vmatprep.mubr.msk.f32.mxu1 %vm4593_vm1, %v4592_v24 }
 0x197   :  { %v4067_v26 = vpop.f32.mrb[0].mxu1 }
 0x198   :  { %v209_v27 = vpop.f32.mrb[1].mxu1  ;;  %v4762_v29 = vadd.f32 %v4067_v26, %v3829_v25 }
 0x199   :  { %v4756_v28 = vadd.f32 %v3829_v25, %v209_v27 }
 0x19b   :  { %224 = vrot.lane.b32.xlu0 %v4756_v28, %s4594_s28  ;;  %220 = vrot.lane.b32.xlu1 %v4756_v28, %s4595_s27 }
 0x19f   :  { %228 = vrot.lane.b32.xlu0 %v4756_v28, %s4596_s29  ;;  %222 = vrot.lane.b32.xlu1 %v4762_v29, %s4595_s27 }
 0x1a3   :  { %232 = vrot.lane.b32.xlu0 %v4756_v28, %s4597_s24  ;;  %226 = vrot.lane.b32.xlu1 %v4762_v29, %s4594_s28 }
 0x1a7   :  { %230 = vrot.lane.b32.xlu1 %v4762_v29, %s4596_s29 }
 0x1ab   :  { %309 = vrot.lane.b32.xlu1 %v4762_v29, %s4597_s24 }
 0x20d   :  { %v4776_v30 = vpop.permute.xlu0 %224  ;;  %v4778_v31 = vpop.permute.xlu1 %220 }
 0x20e   :  { %385 = vrot.lane.b32.xlu0 %v4778_v31, %s4597_s24 }
 0x211   :  { %v4782_v32 = vpop.permute.xlu0 %228  ;;  %v4784_v33 = vpop.permute.xlu1 %222 }
 0x212   :  { %537 = vrot.lane.b32.xlu0 %v4776_v30, %s4597_s24  ;;  %461 = vrot.lane.b32.xlu1 %v4784_v33, %s4597_s24 }
 0x215   :  { %v233_v34 = vpop.permute.xlu0 %232  ;;  %v4790_v35 = vpop.permute.xlu1 %226 }
 0x216   :  { %4069 = vmatpush3.xpose.msk.msra.mxu1 %vm234_vm2, %v233_v34  ;;  %689 = vrot.lane.b32.xlu0 %v4782_v32, %s4597_s24 }
 0x217   :  { %613 = vrot.lane.b32.xlu1 %v4790_v35, %s4597_s24  ;;  %4073 = vmatprep.subr.mxu1 %v4592_v24 }
 0x219   :  { %4071 = vmatmul.mubr.msk.f32.vlgmr.msra.gmra.mrb[2].mxu1 %vm234_vm2, %v4756_v28  ;;  %v4800_v36 = vpop.permute.xlu1 %230 }
 0x21a   :  { %4075 = vmatprep.mubr.msk.f32.mxu1 %vm4593_vm1, %v4592_v24 }
 0x21b   :  { %765 = vrot.lane.b32.xlu1 %v4800_v36, %s4597_s24 }
 0x21d   :  { %v310_v37 = vpop.permute.xlu1 %309 }
 0x21e   :  { %4074 = vmatpush3.xpose.msk.msra.mxu1 %vm234_vm2, %v310_v37 }
 0x21f   :  { %4083 = vmatprep.subr.mxu1 %v4592_v24 }
 0x221   :  { %4076 = vmatmul.mubr.msk.f32.vlgmr.msra.gmra.mrb[4].mxu1 %vm234_vm2, %v4762_v29 }
 0x222   :  { %4085 = vmatprep.mubr.msk.f32.mxu1 %vm4593_vm1, %v4592_v24 }
 0x280   :  { %v386_v38 = vpop.permute.xlu0 %385 }
 0x281   :  { %4079 = vmatpush3.xpose.msk.msra.mxu0 %vm234_vm2, %v386_v38 }
 0x282   :  { %4088 = vmatprep.subr.mxu0 %v4592_v24 }
 0x284   :  { %4081 = vmatmul.mubr.msk.f32.vlgmr.msra.gmra.mrb[0].mxu0 %vm234_vm2, %v4778_v31  ;;  %v538_v39 = vpop.permute.xlu0 %537  ;;  %v462_v40 = vpop.permute.xlu1 %461 }
 0x285   :  { %4084 = vmatpush3.xpose.msk.msra.mxu1 %vm234_vm2, %v462_v40  ;;  %4089 = vmatpush3.xpose.msk.msra.mxu0 %vm234_vm2, %v538_v39 }
 0x286   :  { %4090 = vmatprep.mubr.msk.f32.mxu0 %vm4593_vm1, %v4592_v24  ;;  %4098 = vmatprep.subr.mxu0 %v4592_v24 }
 0x287   :  { %4093 = vmatprep.subr.mxu1 %v4592_v24 }
 0x288   :  { %4091 = vmatmul.mubr.msk.f32.vlgmr.msra.gmra.mrb[2].mxu0 %vm234_vm2, %v4776_v30  ;;  %v690_v41 = vpop.permute.xlu0 %689  ;;  %4086 = vmatmul.mubr.msk.f32.vlgmr.msra.gmra.mrb[6].mxu1 %vm234_vm2, %v4784_v33 }
 0x289   :  { %v614_v42 = vpop.permute.xlu1 %613  ;;  %4099 = vmatpush3.xpose.msk.msra.mxu0 %vm234_vm2, %v690_v41  ;;  %4095 = vmatprep.mubr.msk.f32.mxu1 %vm4593_vm1, %v4592_v24 }
 0x28a   :  { %4094 = vmatpush3.xpose.msk.msra.mxu1 %vm234_vm2, %v614_v42  ;;  %4100 = vmatprep.mubr.msk.f32.mxu0 %vm4593_vm1, %v4592_v24 }
 0x28b   :  { %4103 = vmatprep.subr.mxu1 %v4592_v24  ;;  %4108 = vmatprep.subr.mxu0 %v4592_v24 }
 0x28c   :  { %4101 = vmatmul.mubr.msk.f32.vlgmr.msra.gmra.mrb[4].mxu0 %vm234_vm2, %v4782_v32 }
 0x28d   :  { %4096 = vmatmul.mubr.msk.f32.vlgmr.msra.gmra.mrb[8].mxu1 %vm234_vm2, %v4790_v35  ;;  %v766_v43 = vpop.permute.xlu1 %765  ;;  %4110 = vmatprep.mubr.msk.f32.mxu0 %vm4593_vm1, %v4592_v24 }
 0x28e   :  { %4104 = vmatpush3.xpose.msk.msra.mxu1 %vm234_vm2, %v766_v43  ;;  %4105 = vmatprep.mubr.msk.f32.mxu1 %vm4593_vm1, %v4592_v24 }
 0x28f   :  { %4113 = vmatprep.subr.mxu1 %v4592_v24 }
 0x291   :  { %4106 = vmatmul.mubr.msk.f32.vlgmr.msra.gmra.mrb[10].mxu1 %vm234_vm2, %v4800_v36 }
 0x292   :  { %4115 = vmatprep.mubr.msk.f32.mxu1 %vm4593_vm1, %v4592_v24 }
 0x2ec   :  { %v305_v44 = vpop.f32.mrb[2].mxu1 }
 0x2ed   :  { %v841_v45 = vmul.f32 0.35355338, %v305_v44  ;;  %v4072_v46 = vpop.f32.mrb[3].mxu1 }
 0x2ef   :  { %v849_v47 = vsel %vm234_vm2, %v841_v45, -inf }
 0x2f0   :  { %850 = vmax.xlane.f32.xlu0 %v849_v47 }
 0x2f4   :  { %v381_v48 = vpop.f32.mrb[4].mxu1 }
 0x2f5   :  { %v842_v49 = vmul.f32 0.35355338, %v381_v48  ;;  %v4077_v50 = vpop.f32.mrb[5].mxu1 }
 0x2f7   :  { %v852_v51 = vsel %vm234_vm2, %v842_v49, -inf }
 0x2f8   :  { %853 = vmax.xlane.f32.xlu1 %v852_v51 }
 0x357   :  { %v457_v52 = vpop.f32.mrb[0].mxu0 }
 0x358   :  { %v843_v53 = vmul.f32 0.35355338, %v457_v52  ;;  %v4082_v54 = vpop.f32.mrb[1].mxu0 }
 0x35a   :  { %v855_v55 = vsel %vm234_vm2, %v843_v53, -inf }
 0x35b   :  { %856 = vmax.xlane.f32.xlu0 %v855_v55  ;;  %v533_v56 = vpop.f32.mrb[6].mxu1  ;;  %v609_v57 = vpop.f32.mrb[2].mxu0 }
 0x35c   :  { %v844_v58 = vmul.f32 0.35355338, %v533_v56  ;;  %v845_v59 = vmul.f32 0.35355338, %v609_v57  ;;  %v4087_v60 = vpop.f32.mrb[7].mxu1  ;;  %v4092_v61 = vpop.f32.mrb[3].mxu0 }
 0x35e   :  { %v861_v62 = vsel %vm234_vm2, %v845_v59, -inf  ;;  %v858_v63 = vsel %vm234_vm2, %v844_v58, -inf }
 0x35f   :  { %v761_v0 = vpop.f32.mrb[4].mxu0  ;;  %862 = vmax.xlane.f32.xlu1 %v861_v62  ;;  %859 = vmax.xlane.f32.xlu0 %v858_v63 }
 0x360   :  { %v847_v1 = vmul.f32 0.35355338, %v761_v0  ;;  %v685_v2 = vpop.f32.mrb[8].mxu1  ;;  %v4102_v3 = vpop.f32.mrb[5].mxu0 }
 0x361   :  { %v846_v4 = vmul.f32 0.35355338, %v685_v2  ;;  %v4097_v5 = vpop.f32.mrb[9].mxu1 }
 0x362   :  { %v867_v6 = vsel %vm234_vm2, %v847_v1, -inf }
 0x363   :  { %868 = vmax.xlane.f32.xlu1 %v867_v6  ;;  %v864_v7 = vsel %vm234_vm2, %v846_v4, -inf }
 0x364   :  { %865 = vmax.xlane.f32.xlu0 %v864_v7  ;;  %v837_v8 = vpop.f32.mrb[10].mxu1 }
 0x365   :  { %v848_v9 = vmul.f32 0.35355338, %v837_v8  ;;  %v4107_v10 = vpop.f32.mrb[11].mxu1 }
 0x367   :  { %v870_v11 = vsel %vm234_vm2, %v848_v9, -inf }
 0x368   :  { %871 = vmax.xlane.f32.xlu0 %v870_v11 }
 0x374   :  { %937 = vrot.lane.b32.xlu1 %v4756_v28, %s4598_s25 }
 0x378   :  { %1089 = vrot.lane.b32.xlu1 %v4778_v31, %s4598_s25 }
 0x37c   :  { %1165 = vrot.lane.b32.xlu1 %v4784_v33, %s4598_s25 }
 0x37d   :  { %v851_v13 = vpop.xlane.xlu0 %850 }
 0x37e   :  { %1013 = vrot.lane.b32.xlu0 %v4762_v29, %s4598_s25  ;;  %v873_v15 = vsub.f32 %v841_v45, %v851_v13 }
 0x380   :  { %1317 = vrot.lane.b32.xlu1 %v4790_v35, %s4598_s25  ;;  %v881_v17 = vmul.f32 1.442695, %v873_v15 }
 0x382   :  { %1241 = vrot.lane.b32.xlu0 %v4776_v30, %s4598_s25 }
 0x385   :  { %v854_v12 = vpop.xlane.xlu1 %853 }
 0x386   :  { %v874_v14 = vsub.f32 %v842_v49, %v854_v12 }
 0x388   :  { %v883_v16 = vmul.f32 1.442695, %v874_v14 }
 0x38a   :  { %4415 = vpow2.f32 %v883_v16 }
 0x38b   :  { %4417 = vpow2.f32 %v881_v17 }
 0x394   :  { %v4868_v18 = vpop.eup %4415 }
 0x395   :  { %v4870_v19 = vpop.eup %4417  ;;  %v900_v20 = vsel %vm234_vm2, %v4868_v18, 0.0 }
 0x396   :  { %v897_v22 = vsel %vm234_vm2, %v4870_v19, 0.0 }
 0x3a1   :  { %901 = vadd.xlane.f32.xlu0 %v900_v20 }
 0x3a4   :  { %898 = vadd.xlane.f32.xlu1 %v897_v22 }
 0x3e8   :  { %v857_v25 = vpop.xlane.xlu0 %856 }
 0x3e9   :  { %v875_v26 = vsub.f32 %v843_v53, %v857_v25 }
 0x3eb   :  { %v885_v27 = vmul.f32 1.442695, %v875_v26 }
 0x3ec   :  { %v860_v28 = vpop.xlane.xlu0 %859  ;;  %v863_v29 = vpop.xlane.xlu1 %862 }
 0x3ed   :  { %4419 = vpow2.f32 %v885_v27  ;;  %v876_v30 = vsub.f32 %v844_v58, %v860_v28  ;;  %v877_v31 = vsub.f32 %v845_v59, %v863_v29 }
 0x3ef   :  { %v887_v33 = vmul.f32 1.442695, %v876_v30  ;;  %v889_v34 = vmul.f32 1.442695, %v877_v31  ;;  %v1577_v30 = vld [vmem:[%s5327_s6] sm:$0xff]  ;;  %v1578_v31 = vld [vmem:[%s5327_s6 + $0x8] sm:$0xff] }
 0x3f0   :  { %v869_v35 = vpop.xlane.xlu1 %868 }
 0x3f1   :  { %4421 = vpow2.f32 %v887_v33  ;;  %v866_v37 = vpop.xlane.xlu0 %865  ;;  %v879_v38 = vsub.f32 %v847_v1, %v869_v35  ;;  %v4329_v33 = vpack.c.bf16 %v1578_v31, %v1577_v30  ;;  %v1580_v35 = vld [vmem:[%s5327_s6 + $0x18] sm:$0xff] }
 0x3f2   :  { %4423 = vpow2.f32 %v889_v34  ;;  %v878_v39 = vsub.f32 %v846_v4, %v866_v37  ;;  %v1579_v34 = vld [vmem:[%s5327_s6 + $0x10] sm:$0xff] }
 0x3f3   :  { %v893_v40 = vmul.f32 1.442695, %v879_v38  ;;  %v4333_v37 = vpack.c.bf16 %v1580_v35, %v1579_v34 }
 0x3f4   :  { %v891_v41 = vmul.f32 1.442695, %v878_v39  ;;  %v938_v42 = vpop.permute.xlu1 %937 }
 0x3f5   :  { %4425 = vpow2.f32 %v893_v40  ;;  %v872_v43 = vpop.xlane.xlu0 %871  ;;  %4109 = vmatpush3.msra.mxu0 %v938_v42 }
 0x3f6   :  { %4427 = vpow2.f32 %v891_v41  ;;  %v880_v44 = vsub.f32 %v848_v9, %v872_v43  ;;  %4118 = vmatprep.subr.mxu0 %v4592_v24 }
 0x3f7   :  { %v4420_v45 = vpop.eup %4419 }
 0x3f8   :  { %v895_v46 = vmul.f32 1.442695, %v880_v44  ;;  %v903_v47 = vsel %vm234_vm2, %v4420_v45, 0.0  ;;  %v1090_v59 = vpop.permute.xlu1 %1089 }
 0x3f9   :  { %v1014_v48 = vpop.permute.xlu0 %1013  ;;  %904 = vadd.xlane.f32.xlu1 %v903_v47 }
 0x3fa   :  { %4429 = vpow2.f32 %v895_v46  ;;  %4114 = vmatpush3.msra.mxu1 %v1014_v48 }
 0x3fb   :  { %v4422_v49 = vpop.eup %4421  ;;  %4123 = vmatprep.subr.mxu1 %v4592_v24 }
 0x3fc   :  { %v4424_v50 = vpop.eup %4423  ;;  %v906_v51 = vsel %vm234_vm2, %v4422_v49, 0.0  ;;  %v1166_v60 = vpop.permute.xlu1 %1165 }
 0x3fd   :  { %907 = vadd.xlane.f32.xlu0 %v906_v51  ;;  %v909_v52 = vsel %vm234_vm2, %v4424_v50, 0.0  ;;  %v1242_v61 = vpop.permute.xlu0 %1241 }
 0x3fe   :  { %910 = vadd.xlane.f32.xlu1 %v909_v52 }
 0x3ff   :  { %v4881_v53 = vpop.eup %4425 }
 0x400   :  { %v4428_v54 = vpop.eup %4427  ;;  %v915_v55 = vsel %vm234_vm2, %v4881_v53, 0.0  ;;  %v1318_v62 = vpop.permute.xlu1 %1317 }
 0x401   :  { %v912_v56 = vsel %vm234_vm2, %v4428_v54, 0.0 }
 0x402   :  { %913 = vadd.xlane.f32.xlu0 %v912_v56  ;;  %916 = vadd.xlane.f32.xlu1 %v915_v55 }
 0x404   :  { %v4886_v57 = vpop.eup %4429 }
 0x405   :  { %v918_v58 = vsel %vm234_vm2, %v4886_v57, 0.0 }
 0x406   :  { %919 = vadd.xlane.f32.xlu0 %v918_v58 }
 0x413   :  { %1469 = vrot.lane.b32.xlu1 %v4800_v36, %s4598_s25 }
 0x41c   :  { %1393 = vrot.lane.b32.xlu0 %v4782_v32, %s4598_s25 }
 0x42e   :  { %v902_v63 = vpop.xlane.xlu0 %901 }
 0x42f   :  { %4431 = vrcp.f32 %v902_v63 }
 0x431   :  { %v899_v0 = vpop.xlane.xlu1 %898 }
 0x432   :  { %4433 = vrcp.f32 %v899_v0 }
 0x439   :  { %v4432_v1 = vpop.eup %4431 }
 0x43a   :  { %v930_v2 = vmul.f32 %v4432_v1, %v4868_v18 }
 0x43c   :  { %v4434_v3 = vpop.eup %4433  ;;  %4116 = vmatmul.mubr.msk.f32.vlgmr.msra.gmra.mrb[12].mxu1 %vm234_vm2, %v930_v2 }
 0x43d   :  { %v929_v4 = vmul.f32 %v4434_v3, %v4870_v19  ;;  %4124 = vmatpush3.msra.mxu1 %v1166_v60  ;;  %4125 = vmatprep.mubr.msk.f32.mxu1 %vm4593_vm1, %v4592_v24 }
 0x43e   :  { %4133 = vmatprep.subr.mxu1 %v4592_v24 }
 0x43f   :  { %4111 = vmatmul.mubr.msk.f32.vlgmr.msra.gmra.mrb[6].mxu0 %vm234_vm2, %v929_v4 }
 0x440   :  { %4119 = vmatpush3.msra.mxu0 %v1090_v59  ;;  %4120 = vmatprep.mubr.msk.f32.mxu0 %vm4593_vm1, %v4592_v24 }
 0x441   :  { %4128 = vmatprep.subr.mxu0 %v4592_v24 }
 0x486   :  { %v905_v32 = vpop.xlane.xlu1 %904 }
 0x487   :  { %4435 = vrcp.f32 %v905_v32 }
 0x48a   :  { %v908_v36 = vpop.xlane.xlu0 %907 }
 0x48b   :  { %4437 = vrcp.f32 %v908_v36  ;;  %v911_v5 = vpop.xlane.xlu1 %910 }
 0x48c   :  { %4439 = vrcp.f32 %v911_v5 }
 0x48f   :  { %v914_v6 = vpop.xlane.xlu0 %913  ;;  %v917_v7 = vpop.xlane.xlu1 %916 }
 0x490   :  { %4441 = vrcp.f32 %v914_v6 }
 0x491   :  { %v4436_v8 = vpop.eup %4435  ;;  %4443 = vrcp.f32 %v917_v7 }
 0x492   :  { %v931_v9 = vmul.f32 %v4436_v8, %v4420_v45 }
 0x493   :  { %v920_v10 = vpop.xlane.xlu0 %919  ;;  %v1470_v20 = vpop.permute.xlu1 %1469 }
 0x494   :  { %4445 = vrcp.f32 %v920_v10  ;;  %4121 = vmatmul.mubr.msk.f32.vlgmr.msra.gmra.mrb[8].mxu0 %vm234_vm2, %v931_v9 }
 0x495   :  { %v4438_v11 = vpop.eup %4437  ;;  %4129 = vmatpush3.msra.mxu0 %v1242_v61  ;;  %4130 = vmatprep.mubr.msk.f32.mxu0 %vm4593_vm1, %v4592_v24 }
 0x496   :  { %v4440_v12 = vpop.eup %4439  ;;  %v932_v13 = vmul.f32 %v4438_v11, %v4422_v49  ;;  %4138 = vmatprep.subr.mxu0 %v4592_v24 }
 0x497   :  { %v933_v14 = vmul.f32 %v4440_v12, %v4424_v50  ;;  %v1394_v15 = vpop.permute.xlu0 %1393 }
 0x498   :  { %4126 = vmatmul.mubr.msk.f32.vlgmr.msra.gmra.mrb[14].mxu1 %vm234_vm2, %v932_v13 }
 0x499   :  { %4131 = vmatmul.mubr.msk.f32.vlgmr.msra.gmra.mrb[10].mxu0 %vm234_vm2, %v933_v14  ;;  %4134 = vmatpush3.msra.mxu1 %v1318_v62  ;;  %v3856_v62 = vld [vmem:[%s5328_s7] ss:$0 sm:$0xff]  ;;  %v1717_v14 = vld [vmem:[%s5331_s10 + $0x8] sm:$0xff] }
 0x49a   :  { %v4442_v16 = vpop.eup %4441  ;;  %4139 = vmatpush3.msra.mxu0 %v1394_v15  ;;  %4135 = vmatprep.mubr.msk.f32.mxu1 %vm4593_vm1, %v4592_v24 }
 0x49b   :  { %v4444_v17 = vpop.eup %4443  ;;  %v934_v18 = vmul.f32 %v4442_v16, %v4428_v54  ;;  %4140 = vmatprep.mubr.msk.f32.mxu0 %vm4593_vm1, %v4592_v24  ;;  %4143 = vmatprep.subr.mxu1 %v4592_v24  ;;  %v1718_v16 = vld [vmem:[%s5331_s10 + $0x10] sm:$0xff] }
 0x49c   :  { %v935_v19 = vmul.f32 %v4444_v17, %v4881_v53  ;;  %4330 = vmatprep.subr.bf16.mxu0 %v4329_v33  ;;  %v1719_v17 = vld [vmem:[%s5331_s10 + $0x18] sm:$0xff] }
 0x49d   :  { %4136 = vmatmul.mubr.msk.f32.vlgmr.msra.gmra.mrb[16].mxu1 %vm234_vm2, %v934_v18  ;;  %v4341_v18 = vpack.c.bf16 %v1719_v17, %v1718_v16 }
 0x49e   :  { %v4446_v22 = vpop.eup %4445  ;;  %4141 = vmatmul.mubr.msk.f32.vlgmr.msra.gmra.mrb[12].mxu0 %vm234_vm2, %v935_v19  ;;  %4144 = vmatpush3.msra.mxu1 %v1470_v20  ;;  %v1810_v19 = vld [vmem:[%s5333_s12] sm:$0xff]  ;;  %v1811_v20 = vld [vmem:[%s5333_s12 + $0x8] sm:$0xff] }
 0x49f   :  { %v936_v25 = vmul.f32 %v4446_v22, %v4886_v57  ;;  %4145 = vmatprep.mubr.msk.f32.mxu1 %vm4593_vm1, %v4592_v24  ;;  %4332 = vmatpush3.bf16.msra.mxu0 %v4329_v33  ;;  %v1812_v22 = vld [vmem:[%s5333_s12 + $0x10] sm:$0xff] }
 0x4a0   :  { %4334 = vmatprep.subr.bf16.mxu0 %v4333_v37 }
 0x4a1   :  { %4146 = vmatmul.mubr.msk.f32.vlgmr.msra.gmra.mrb[18].mxu1 %vm234_vm2, %v936_v25  ;;  %v4345_v25 = vpack.c.bf16 %v1811_v20, %v1810_v19 }
 0x4a3   :  { %4336 = vmatpush3.bf16.msra.mxu0 %v4333_v37 }
 0x4a4   :  { %4346 = vmatprep.subr.bf16.mxu0 %v4345_v25 }
 0x50f   :  { %v1085_v26 = vpop.f32.mrb[12].mxu1 }
 0x510   :  { %v4117_v27 = vpop.f32.mrb[13].mxu1 }
 0x512   :  { %v1009_v28 = vpop.f32.mrb[6].mxu0 }
 0x513   :  { %v4112_v29 = vpop.f32.mrb[7].mxu0 }
 0x514   :  { %v1815_v29 = vld [vmem:[%s5333_s12 + $0x28] sm:$0xff] }
 0x567   :  { %v1161_v38 = vpop.f32.mrb[8].mxu0 }
 0x568   :  { %1547 = vrot.lane.b32.xlu0 %v1161_v38, %s4599_s20  ;;  %v4122_v39 = vpop.f32.mrb[9].mxu0 }
 0x56b   :  { %v1237_v40 = vpop.f32.mrb[14].mxu1 }
 0x56c   :  { %v1313_v41 = vpop.f32.mrb[10].mxu0  ;;  %1549 = vrot.lane.b32.xlu1 %v1237_v40, %s4599_s20  ;;  %v4127_v42 = vpop.f32.mrb[15].mxu1  ;;  %v3859_v40 = vld [vmem:[%s5329_s8] ss:$0 sm:$0xff] }
 0x56d   :  { %1555 = vrot.lane.b32.xlu0 %v1313_v41, %s4600_s21  ;;  %v4132_v43 = vpop.f32.mrb[11].mxu0  ;;  %v3860_v42 = vld [vmem:[%s5330_s9] ss:$0 sm:$0xff] }
 0x570   :  { %v1389_v44 = vpop.f32.mrb[16].mxu1 }
 0x571   :  { %v1465_v45 = vpop.f32.mrb[12].mxu0  ;;  %1557 = vrot.lane.b32.xlu1 %v1389_v44, %s4600_s21  ;;  %v4137_v46 = vpop.f32.mrb[17].mxu1 }
 0x572   :  { %1563 = vrot.lane.b32.xlu0 %v1465_v45, %s4601_s23  ;;  %v4142_v47 = vpop.f32.mrb[13].mxu0 }
 0x574   :  { %v1541_v48 = vpop.f32.mrb[18].mxu1 }
 0x575   :  { %1565 = vrot.lane.b32.xlu1 %v1541_v48, %s4601_s23  ;;  %v4147_v49 = vpop.f32.mrb[19].mxu1 }
 0x576   :  { %v1816_v49 = vld [vmem:[%s5333_s12 + $0x30] sm:$0xff] }
 0x5da   :  { %v1548_v50 = vpop.permute.xlu0 %1547 }
 0x5db   :  { %v1569_v53 = vsel %vm234_vm2, %v1009_v28, %v1548_v50  ;;  %v1814_v28 = vld [vmem:[%s5333_s12 + $0x20] sm:$0xff]  ;;  %v1817_v50 = vld [vmem:[%s5333_s12 + $0x38] sm:$0xff] }
 0x5dc   :  { %v4353_v30 = vpack.c.bf16 %v1815_v29, %v1814_v28 }
 0x5de   :  { %v1550_v51 = vpop.permute.xlu1 %1549 }
 0x5df   :  { %v1556_v52 = vpop.permute.xlu0 %1555  ;;  %v1570_v58 = vsel %vm234_vm2, %v1085_v26, %v1550_v51  ;;  %v1813_v26 = vld [vmem:[%s5333_s12 + $0x18] sm:$0xff]  ;;  %v4357_v51 = vpack.c.bf16 %v1817_v50, %v1816_v49 }
 0x5e0   :  { %v1572_v55 = vsel %vm1571_vm3, %v1569_v53, %v1556_v52  ;;  %v4349_v27 = vpack.c.bf16 %v1813_v26, %v1812_v22  ;;  %v3861_v52 = vld [vmem:[%s5332_s11] ss:$0 sm:$0xff] }
 0x5e1   :  { %v3867_v26 = vld [vmem:[%s5335_s14] ss:$0 sm:$0xff] }
 0x5e3   :  { %v1558_v54 = vpop.permute.xlu1 %1557 }
 0x5e4   :  { %v1564_v56 = vpop.permute.xlu0 %1563  ;;  %v1573_v59 = vsel %vm1571_vm3, %v1570_v58, %v1558_v54 }
 0x5e5   :  { %v1575_v57 = vsel %vm1574_vm4, %v1572_v55, %v1564_v56 }
 0x5e6   :  { %4156 = vmatprep.mubr.msk.f32.mxu0 %vm136_vm0, %v1575_v57 }
 0x5e7   :  { %v1566_v60 = vpop.permute.xlu1 %1565 }
 0x5e8   :  { %v1576_v61 = vsel %vm1574_vm4, %v1573_v59, %v1566_v60  ;;  %v3864_v59 = vld [vmem:[%s5334_s13] ss:$0 sm:$0xff] }
 0x5e9   :  { %4157 = vmatmul.mubr.msk.f32.vlgmr.msra.gmra.mrb[14].mxu0 %vm136_vm0, %v1576_v61 }
 0x5ea   :  { %4348 = vmatpush3.bf16.msra.mxu0 %v4345_v25 }
 0x5eb   :  { %4350 = vmatprep.subr.bf16.mxu0 %v4349_v27 }
 0x5ee   :  { %4352 = vmatpush3.bf16.msra.mxu0 %v4349_v27 }
 0x5ef   :  { %4354 = vmatprep.subr.bf16.mxu0 %v4353_v30 }
 0x5f2   :  { %4356 = vmatpush3.bf16.msra.mxu0 %v4353_v30  ;;  %v3868_v30 = vld [vmem:[%s5336_s15] ss:$0 sm:$0xff] }
 0x5f3   :  { %4358 = vmatprep.subr.bf16.mxu0 %v4357_v51 }
 0x5f6   :  { %4360 = vmatpush3.bf16.msra.mxu0 %v4357_v51 }
 0x5f7   :  { %4210 = vmatprep.subr.mxu0 %v4592_v24 }
 0x6bc   :  { %v4158_v63 = vpop.f32.mrb[14].mxu0 }
 0x6bd   :  { %v1666_v0 = vadd.f32 %v4158_v63, %v3856_v62  ;;  %v1660_v1 = vpop.f32.mrb[15].mxu0 }
 0x6be   :  { %v1661_v2 = vadd.f32 %v3856_v62, %v1660_v1 }
 0x6bf   :  { %v1670_v3 = vadd.f32 %v1666_v0, %v4743_v23 }
 0x6c0   :  { %v1669_v4 = vadd.f32 %v1661_v2, %v4739_v21  ;;  %v1716_v21 = vld [vmem:[%s5331_s10] sm:$0xff] }
 0x6c1   :  { %v1676_v32 = vsel %vm136_vm0, %v1670_v3, 0.0  ;;  %v4337_v15 = vpack.c.bf16 %v1717_v14, %v1716_v21  ;;  %v3871_v21 = vld [vmem:[%s5325_s4 + $0x30] sm:$0xff]  ;;  %v3872_v14 = vld [vmem:[%s5325_s4 + $0x38] sm:$0xff] }
 0x6c2   :  { %1677 = vadd.xlane.f32.xlu1 %v1676_v32  ;;  %v1673_v36 = vsel %vm136_vm0, %v1669_v4, 0.0 }
 0x6c3   :  { %1674 = vadd.xlane.f32.xlu0 %v1673_v36  ;;  %4338 = vmatprep.subr.bf16.mxu1 %v4337_v15 }
 0x6c4   :  { %4340 = vmatpush3.bf16.msra.mxu1 %v4337_v15  ;;  %v4365_v15 = vpack.c.bf16 %v3872_v14, %v3871_v21 }
 0x6c5   :  { %4342 = vmatprep.subr.bf16.mxu1 %v4341_v18 }
 0x6c8   :  { %4344 = vmatpush3.bf16.msra.mxu1 %v4341_v18 }
 0x74f   :  { %v1678_v5 = vpop.xlane.xlu1 %1677 }
 0x750   :  { %v1681_v6 = vmul.f32 0.03125, %v1678_v5  ;;  %v1675_v7 = vpop.xlane.xlu0 %1674 }
 0x751   :  { %v1680_v8 = vmul.f32 0.03125, %v1675_v7 }
 0x752   :  { %v1683_v9 = vsub.f32 %v1670_v3, %v1681_v6 }
 0x753   :  { %v1682_v10 = vsub.f32 %v1669_v4, %v1680_v8 }
 0x754   :  { %v1685_v13 = vmul.f32 %v1683_v9, %v1683_v9 }
 0x755   :  { %v1684_v11 = vmul.f32 %v1682_v10, %v1682_v10 }
 0x756   :  { %v1689_v23 = vsel %vm136_vm0, %v1685_v13, 0.0  ;;  %v3870_v13 = vld [vmem:[%s5325_s4 + $0x28] sm:$0xff] }
 0x757   :  { %v1686_v12 = vsel %vm136_vm0, %v1684_v11, 0.0 }
 0x758   :  { %1687 = vadd.xlane.f32.xlu0 %v1686_v12  ;;  %v3869_v12 = vld [vmem:[%s5325_s4 + $0x20] sm:$0xff] }
 0x75c   :  { %1690 = vadd.xlane.f32.xlu0 %v1689_v23  ;;  %v4361_v23 = vpack.c.bf16 %v3870_v13, %v3869_v12 }
 0x75e   :  { %4362 = vmatprep.subr.bf16.mxu1 %v4361_v23 }
 0x7e5   :  { %v1688_v31 = vpop.xlane.xlu0 %1687 }
 0x7e6   :  { %v1692_v33 = vmul.f32 0.03125, %v1688_v31 }
 0x7e8   :  { %v1694_v34 = vadd.f32 1e-05, %v1692_v33 }
 0x7e9   :  { %v1691_v35 = vpop.xlane.xlu0 %1690 }
 0x7ea   :  { %4447 = vrsqrt.f32 %v1694_v34  ;;  %v1693_v37 = vmul.f32 0.03125, %v1691_v35 }
 0x7ec   :  { %v1695_v38 = vadd.f32 1e-05, %v1693_v37  ;;  %v3874_v37 = vld [vmem:[%s5326_s5 + $0x1] ss:$0 sm:$0xff] }
 0x7ee   :  { %4449 = vrsqrt.f32 %v1695_v38 }
 0x7f4   :  { %v4448_v39 = vpop.eup %4447 }
 0x7f5   :  { %v1698_v41 = vmul.f32 %v4448_v39, %v1682_v10 }
 0x7f7   :  { %v1706_v43 = vmul.f32 %v3859_v40, %v1698_v41 }
 0x7f8   :  { %v4450_v44 = vpop.eup %4449 }
 0x7f9   :  { %v1699_v45 = vmul.f32 %v4450_v44, %v1683_v9  ;;  %v1714_v46 = vadd.f32 %v3860_v42, %v1706_v43 }
 0x7fb   :  { %v1707_v47 = vmul.f32 %v3859_v40, %v1699_v45  ;;  %4167 = vmatprep.mubr.msk.f32.mxu1 %vm136_vm0, %v1714_v46 }
 0x7fd   :  { %v1715_v48 = vadd.f32 %v3860_v42, %v1707_v47 }
 0x7ff   :  { %4168 = vmatmul.mubr.msk.f32.vlgmr.msra.gmra.mrb[20].mxu1 %vm136_vm0, %v1715_v48 }
 0x800   :  { %4364 = vmatpush3.bf16.msra.mxu1 %v4361_v23 }
 0x801   :  { %4366 = vmatprep.subr.bf16.mxu1 %v4365_v15 }
 0x804   :  { %4368 = vmatpush3.bf16.msra.mxu1 %v4365_v15 }
 0x805   :  { %4200 = vmatprep.subr.mxu1 %v4592_v24 }
 0x8d2   :  { %v4169_v53 = vpop.f32.mrb[20].mxu1 }
 0x8d3   :  { %v1805_v54 = vadd.f32 %v4169_v53, %v3861_v52  ;;  %v1799_v55 = vpop.f32.mrb[21].mxu1 }
 0x8d4   :  { %v1800_v56 = vadd.f32 %v3861_v52, %v1799_v55 }
 0x8d5   :  { %v1809_v58 = vmax.f32 %v1805_v54, 0.0 }
 0x8d6   :  { %v1808_v57 = vmax.f32 %v1800_v56, 0.0 }
 0x8d8   :  { %4186 = vmatprep.mubr.msk.f32.mxu0 %vm1825_vm5, %v1808_v57 }
 0x8d9   :  { %4187 = vmatmul.mubr.msk.f32.vlgmr.msra.gmra.mrb[16].mxu0 %vm1825_vm5, %v1809_v58 }
 0x8da   :  { %4212 = vmatprep.mubr.msk.f32.mxu0 %vm4593_vm1, %v4592_v24 }
 0x9ac   :  { %v4188_v60 = vpop.f32.mrb[16].mxu0 }
 0x9ad   :  { %v1904_v61 = vadd.f32 %v4188_v60, %v3864_v59  ;;  %v1898_v62 = vpop.f32.mrb[17].mxu0 }
 0x9ae   :  { %v1899_v63 = vadd.f32 %v3864_v59, %v1898_v62 }
 0x9af   :  { %v1908_v0 = vadd.f32 %v1904_v61, %v1715_v48 }
 0x9b0   :  { %v1907_v1 = vadd.f32 %v1899_v63, %v1714_v46 }
 0x9b1   :  { %v1914_v2 = vsel %vm136_vm0, %v1908_v0, 0.0 }
 0x9b2   :  { %1915 = vadd.xlane.f32.xlu0 %v1914_v2  ;;  %v1911_v3 = vsel %vm136_vm0, %v1907_v1, 0.0 }
 0x9b3   :  { %1912 = vadd.xlane.f32.xlu1 %v1911_v3 }
 0xa3f   :  { %v1916_v4 = vpop.xlane.xlu0 %1915 }
 0xa40   :  { %v1918_v32 = vmul.f32 0.03125, %v1916_v4  ;;  %v1913_v36 = vpop.xlane.xlu1 %1912 }
 0xa41   :  { %v1917_v5 = vmul.f32 0.03125, %v1913_v36 }
 0xa42   :  { %v1920_v6 = vsub.f32 %v1908_v0, %v1918_v32 }
 0xa43   :  { %v1919_v7 = vsub.f32 %v1907_v1, %v1917_v5 }
 0xa44   :  { %v1922_v8 = vmul.f32 %v1920_v6, %v1920_v6 }
 0xa45   :  { %v1921_v9 = vmul.f32 %v1919_v7, %v1919_v7 }
 0xa46   :  { %v1926_v10 = vsel %vm136_vm0, %v1922_v8, 0.0 }
 0xa47   :  { %1927 = vadd.xlane.f32.xlu0 %v1926_v10  ;;  %v1923_v11 = vsel %vm136_vm0, %v1921_v9, 0.0 }
 0xa48   :  { %1924 = vadd.xlane.f32.xlu1 %v1923_v11 }
 0xad4   :  { %v1928_v16 = vpop.xlane.xlu0 %1927 }
 0xad5   :  { %v1930_v17 = vmul.f32 0.03125, %v1928_v16  ;;  %v1925_v18 = vpop.xlane.xlu1 %1924 }
 0xad6   :  { %v1929_v19 = vmul.f32 0.03125, %v1925_v18 }
 0xad7   :  { %v1932_v20 = vadd.f32 1e-05, %v1930_v17 }
 0xad8   :  { %v1931_v22 = vadd.f32 1e-05, %v1929_v19 }
 0xad9   :  { %4451 = vrsqrt.f32 %v1932_v20 }
 0xada   :  { %4453 = vrsqrt.f32 %v1931_v22 }
 0xae3   :  { %v4452_v25 = vpop.eup %4451 }
 0xae4   :  { %v4454_v27 = vpop.eup %4453  ;;  %v1936_v28 = vmul.f32 %v4452_v25, %v1920_v6 }
 0xae5   :  { %v1935_v29 = vmul.f32 %v4454_v27, %v1919_v7 }
 0xae6   :  { %v1944_v31 = vmul.f32 %v3867_v26, %v1936_v28 }
 0xae7   :  { %v1943_v33 = vmul.f32 %v3867_v26, %v1935_v29 }
 0xae8   :  { %v5037_v35 = vadd.f32 %v3868_v30, %v1944_v31 }
 0xae9   :  { %v5035_v34 = vadd.f32 %v3868_v30, %v1943_v33 }
 0xaeb   :  { %4197 = vmatprep.mubr.msk.f32.mxu1 %vm136_vm0, %v5035_v34 }
 0xaec   :  { %4198 = vmatmul.mubr.msk.f32.vlgmr.msra.gmra.mrb[22].mxu1 %vm136_vm0, %v5037_v35 }
 0xaed   :  { %4202 = vmatprep.mubr.msk.f32.mxu1 %vm4593_vm1, %v4592_v24 }
 0xbbf   :  { %v4199_v38 = vpop.f32.mrb[22].mxu1 }
 0xbc0   :  { %v5048_v39 = vadd.f32 %v4199_v38, %v3874_v37  ;;  %v2038_v40 = vpop.f32.mrb[23].mxu1 }
 0xbc1   :  { %v5050_v41 = vadd.f32 %v3874_v37, %v2038_v40 }
 0xbc2   :  { %2051 = vrot.lane.b32.xlu0 %v5048_v39, %s4595_s27 }
 0xbc3   :  { %2049 = vrot.lane.b32.xlu1 %v5050_v41, %s4595_s27 }
 0xbc6   :  { %2057 = vrot.lane.b32.xlu0 %v5050_v41, %s4596_s29 }
 0xbc7   :  { %2053 = vrot.lane.b32.xlu1 %v5050_v41, %s4594_s28 }
 0xbca   :  { %2061 = vrot.lane.b32.xlu0 %v5050_v41, %s4597_s24 }
 0xbcb   :  { %2055 = vrot.lane.b32.xlu1 %v5048_v39, %s4594_s28 }
 0xbcf   :  { %2059 = vrot.lane.b32.xlu1 %v5048_v39, %s4596_s29 }
 0xbd3   :  { %2137 = vrot.lane.b32.xlu1 %v5048_v39, %s4597_s24 }
 0xc34   :  { %v5068_v42 = vpop.permute.xlu0 %2051 }
 0xc35   :  { %2289 = vrot.lane.b32.xlu1 %v5068_v42, %s4597_s24  ;;  %v5072_v43 = vpop.permute.xlu1 %2049 }
 0xc36   :  { %2213 = vrot.lane.b32.xlu0 %v5072_v43, %s4597_s24 }
 0xc38   :  { %v5076_v44 = vpop.permute.xlu0 %2057 }
 0xc39   :  { %v5078_v45 = vpop.permute.xlu1 %2053 }
 0xc3a   :  { %2365 = vrot.lane.b32.xlu0 %v5078_v45, %s4597_s24 }
 0xc3c   :  { %v2062_v46 = vpop.permute.xlu0 %2061 }
 0xc3d   :  { %4201 = vmatpush3.xpose.msk.msra.mxu1 %vm234_vm2, %v2062_v46  ;;  %v5083_v47 = vpop.permute.xlu1 %2055 }
 0xc3e   :  { %2517 = vrot.lane.b32.xlu0 %v5076_v44, %s4597_s24  ;;  %2441 = vrot.lane.b32.xlu1 %v5083_v47, %s4597_s24 }
 0xc3f   :  { %4205 = vmatprep.subr.mxu1 %v4592_v24 }
 0xc40   :  { %4203 = vmatmul.mubr.msk.f32.vlgmr.msra.gmra.mrb[24].mxu1 %vm234_vm2, %v5050_v41 }
 0xc41   :  { %v5092_v48 = vpop.permute.xlu1 %2059  ;;  %4207 = vmatprep.mubr.msk.f32.mxu1 %vm4593_vm1, %v4592_v24 }
 0xc42   :  { %2593 = vrot.lane.b32.xlu1 %v5092_v48, %s4597_s24 }
 0xc45   :  { %v2138_v49 = vpop.permute.xlu1 %2137 }
 0xc46   :  { %4206 = vmatpush3.xpose.msk.msra.mxu1 %vm234_vm2, %v2138_v49 }
 0xc47   :  { %4215 = vmatprep.subr.mxu1 %v4592_v24 }
 0xc49   :  { %4208 = vmatmul.mubr.msk.f32.vlgmr.msra.gmra.mrb[26].mxu1 %vm234_vm2, %v5048_v39 }
 0xc4a   :  { %4217 = vmatprep.mubr.msk.f32.mxu1 %vm4593_vm1, %v4592_v24 }
 0xca7   :  { %v2290_v50 = vpop.permute.xlu1 %2289 }
 0xca8   :  { %v2214_v51 = vpop.permute.xlu0 %2213  ;;  %4216 = vmatpush3.xpose.msk.msra.mxu1 %vm234_vm2, %v2290_v50 }
 0xca9   :  { %4211 = vmatpush3.xpose.msk.msra.mxu0 %vm234_vm2, %v2214_v51  ;;  %4225 = vmatprep.subr.mxu1 %v4592_v24 }
 0xcaa   :  { %4220 = vmatprep.subr.mxu0 %v4592_v24 }
 0xcab   :  { %4218 = vmatmul.mubr.msk.f32.vlgmr.msra.gmra.mrb[28].mxu1 %vm234_vm2, %v5068_v42 }
 0xcac   :  { %4213 = vmatmul.mubr.msk.f32.vlgmr.msra.gmra.mrb[18].mxu0 %vm234_vm2, %v5072_v43  ;;  %v2366_v52 = vpop.permute.xlu0 %2365  ;;  %4227 = vmatprep.mubr.msk.f32.mxu1 %vm4593_vm1, %v4592_v24 }
 0xcad   :  { %4221 = vmatpush3.xpose.msk.msra.mxu0 %vm234_vm2, %v2366_v52  ;;  %4222 = vmatprep.mubr.msk.f32.mxu0 %vm4593_vm1, %v4592_v24 }
 0xcae   :  { %4230 = vmatprep.subr.mxu0 %v4592_v24 }
 0xcb0   :  { %4223 = vmatmul.mubr.msk.f32.vlgmr.msra.gmra.mrb[20].mxu0 %vm234_vm2, %v5078_v45  ;;  %v2518_v53 = vpop.permute.xlu0 %2517  ;;  %v2442_v54 = vpop.permute.xlu1 %2441 }
 0xcb1   :  { %4226 = vmatpush3.xpose.msk.msra.mxu1 %vm234_vm2, %v2442_v54  ;;  %4231 = vmatpush3.xpose.msk.msra.mxu0 %vm234_vm2, %v2518_v53 }
 0xcb2   :  { %4232 = vmatprep.mubr.msk.f32.mxu0 %vm4593_vm1, %v4592_v24  ;;  %4235 = vmatprep.subr.mxu1 %v4592_v24 }
 0xcb3   :  { %4240 = vmatprep.subr.mxu0 %v4592_v24 }
 0xcb4   :  { %4228 = vmatmul.mubr.msk.f32.vlgmr.msra.gmra.mrb[30].mxu1 %vm234_vm2, %v5083_v47  ;;  %4233 = vmatmul.mubr.msk.f32.vlgmr.msra.gmra.mrb[22].mxu0 %vm234_vm2, %v5076_v44  ;;  %v2594_v55 = vpop.permute.xlu1 %2593 }
 0xcb5   :  { %4236 = vmatpush3.xpose.msk.msra.mxu1 %vm234_vm2, %v2594_v55  ;;  %4237 = vmatprep.mubr.msk.f32.mxu1 %vm4593_vm1, %v4592_v24 }
 0xcb6   :  { %4245 = vmatprep.subr.mxu1 %v4592_v24  ;;  %4242 = vmatprep.mubr.msk.f32.mxu0 %vm4593_vm1, %v4592_v24 }
 0xcb8   :  { %4238 = vmatmul.mubr.msk.f32.vlgmr.msra.gmra.mrb[32].mxu1 %vm234_vm2, %v5092_v48 }
 0xcb9   :  { %4247 = vmatprep.mubr.msk.f32.mxu1 %vm4593_vm1, %v4592_v24 }
 0xd13   :  { %v2133_v56 = vpop.f32.mrb[24].mxu1 }
 0xd14   :  { %v2669_v57 = vmul.f32 0.35355338, %v2133_v56  ;;  %v4204_v58 = vpop.f32.mrb[25].mxu1 }
 0xd16   :  { %v2677_v59 = vsel %vm234_vm2, %v2669_v57, -inf }
 0xd17   :  { %2678 = vmax.xlane.f32.xlu0 %v2677_v59 }
 0xd1c   :  { %v2209_v60 = vpop.f32.mrb[26].mxu1 }
 0xd1d   :  { %v2670_v61 = vmul.f32 0.35355338, %v2209_v60  ;;  %v4209_v62 = vpop.f32.mrb[27].mxu1 }
 0xd1f   :  { %v2680_v63 = vsel %vm234_vm2, %v2670_v61, -inf }
 0xd20   :  { %2681 = vmax.xlane.f32.xlu1 %v2680_v63 }
 0xd7e   :  { %v2361_v0 = vpop.f32.mrb[28].mxu1 }
 0xd7f   :  { %v2285_v1 = vpop.f32.mrb[18].mxu0  ;;  %v4219_v2 = vpop.f32.mrb[29].mxu1  ;;  %v2672_v32 = vmul.f32 0.35355338, %v2361_v0 }
 0xd80   :  { %v2671_v3 = vmul.f32 0.35355338, %v2285_v1  ;;  %v4214_v4 = vpop.f32.mrb[19].mxu0 }
 0xd81   :  { %v2686_v9 = vsel %vm234_vm2, %v2672_v32, -inf }
 0xd82   :  { %v2683_v36 = vsel %vm234_vm2, %v2671_v3, -inf }
 0xd83   :  { %2684 = vmax.xlane.f32.xlu0 %v2683_v36  ;;  %v2437_v5 = vpop.f32.mrb[20].mxu0 }
 0xd84   :  { %v2673_v6 = vmul.f32 0.35355338, %v2437_v5  ;;  %v4224_v7 = vpop.f32.mrb[21].mxu0 }
 0xd86   :  { %v2689_v8 = vsel %vm234_vm2, %v2673_v6, -inf }
 0xd87   :  { %v2589_v10 = vpop.f32.mrb[22].mxu0  ;;  %2690 = vmax.xlane.f32.xlu1 %v2689_v8  ;;  %2687 = vmax.xlane.f32.xlu0 %v2686_v9  ;;  %v2513_v11 = vpop.f32.mrb[30].mxu1 }
 0xd88   :  { %v2675_v12 = vmul.f32 0.35355338, %v2589_v10  ;;  %v2674_v13 = vmul.f32 0.35355338, %v2513_v11  ;;  %v4229_v23 = vpop.f32.mrb[31].mxu1  ;;  %v4234_v21 = vpop.f32.mrb[23].mxu0 }
 0xd8a   :  { %v2695_v14 = vsel %vm234_vm2, %v2675_v12, -inf  ;;  %v2692_v15 = vsel %vm234_vm2, %v2674_v13, -inf }
 0xd8b   :  { %2696 = vmax.xlane.f32.xlu1 %v2695_v14  ;;  %2693 = vmax.xlane.f32.xlu0 %v2692_v15  ;;  %v2665_v16 = vpop.f32.mrb[32].mxu1 }
 0xd8c   :  { %v2676_v17 = vmul.f32 0.35355338, %v2665_v16  ;;  %v4239_v18 = vpop.f32.mrb[33].mxu1 }
 0xd8e   :  { %v2698_v19 = vsel %vm234_vm2, %v2676_v17, -inf }
 0xd8f   :  { %2699 = vmax.xlane.f32.xlu0 %v2698_v19 }
 0xd9c   :  { %2765 = vrot.lane.b32.xlu1 %v5050_v41, %s4598_s25 }
 0xda0   :  { %2917 = vrot.lane.b32.xlu1 %v5072_v43, %s4598_s25 }
 0xda4   :  { %2993 = vrot.lane.b32.xlu1 %v5068_v42, %s4598_s25  ;;  %v2679_v25 = vpop.xlane.xlu0 %2678 }
 0xda5   :  { %2841 = vrot.lane.b32.xlu0 %v5048_v39, %s4598_s25  ;;  %v2701_v26 = vsub.f32 %v2669_v57, %v2679_v25 }
 0xda7   :  { %v2709_v28 = vmul.f32 1.442695, %v2701_v26 }
 0xda8   :  { %3145 = vrot.lane.b32.xlu1 %v5083_v47, %s4598_s25 }
 0xda9   :  { %3069 = vrot.lane.b32.xlu0 %v5078_v45, %s4598_s25 }
 0xdad   :  { %v2682_v20 = vpop.xlane.xlu1 %2681 }
 0xdae   :  { %v2702_v22 = vsub.f32 %v2670_v61, %v2682_v20 }
 0xdb0   :  { %v2711_v27 = vmul.f32 1.442695, %v2702_v22 }
 0xdb2   :  { %4455 = vpow2.f32 %v2711_v27 }
 0xdb3   :  { %4457 = vpow2.f32 %v2709_v28 }
 0xdbc   :  { %v5160_v29 = vpop.eup %4455 }
 0xdbd   :  { %v2728_v30 = vsel %vm234_vm2, %v5160_v29, 0.0  ;;  %v5164_v31 = vpop.eup %4457 }
 0xdbe   :  { %v2725_v33 = vsel %vm234_vm2, %v5164_v31, 0.0 }
 0xdc8   :  { %2729 = vadd.xlane.f32.xlu0 %v2728_v30 }
 0xdcc   :  { %2726 = vadd.xlane.f32.xlu1 %v2725_v33 }
 0xe10   :  { %v2685_v37 = vpop.xlane.xlu0 %2684 }
 0xe11   :  { %v2703_v38 = vsub.f32 %v2671_v3, %v2685_v37 }
 0xe13   :  { %v2713_v39 = vmul.f32 1.442695, %v2703_v38 }
 0xe14   :  { %v2688_v40 = vpop.xlane.xlu0 %2687  ;;  %v2691_v41 = vpop.xlane.xlu1 %2690 }
 0xe15   :  { %4459 = vpow2.f32 %v2713_v39  ;;  %v2704_v42 = vsub.f32 %v2672_v32, %v2688_v40  ;;  %v2705_v43 = vsub.f32 %v2673_v6, %v2691_v41 }
 0xe17   :  { %v2715_v45 = vmul.f32 1.442695, %v2704_v42  ;;  %v2717_v46 = vmul.f32 1.442695, %v2705_v43  ;;  %v3901_v42 = vld [vmem:[%s5327_s6 + $0x20] sm:$0xff]  ;;  %v3902_v43 = vld [vmem:[%s5327_s6 + $0x28] sm:$0xff] }
 0xe18   :  { %v2694_v47 = vpop.xlane.xlu0 %2693  ;;  %v2697_v49 = vpop.xlane.xlu1 %2696 }
 0xe19   :  { %4461 = vpow2.f32 %v2715_v45  ;;  %v2706_v50 = vsub.f32 %v2674_v13, %v2694_v47  ;;  %v2707_v51 = vsub.f32 %v2675_v12, %v2697_v49  ;;  %v4369_v45 = vpack.c.bf16 %v3902_v43, %v3901_v42 }
 0xe1a   :  { %4463 = vpow2.f32 %v2717_v46  ;;  %v3904_v46 = vld [vmem:[%s5327_s6 + $0x38] sm:$0xff] }
 0xe1b   :  { %v2719_v52 = vmul.f32 1.442695, %v2706_v50  ;;  %v2721_v53 = vmul.f32 1.442695, %v2707_v51 }
 0xe1c   :  { %v2700_v54 = vpop.xlane.xlu0 %2699  ;;  %v2766_v55 = vpop.permute.xlu1 %2765 }
 0xe1d   :  { %4465 = vpow2.f32 %v2719_v52  ;;  %v2708_v56 = vsub.f32 %v2676_v17, %v2700_v54  ;;  %4241 = vmatpush3.msra.mxu0 %v2766_v55 }
 0xe1e   :  { %4467 = vpow2.f32 %v2721_v53  ;;  %4250 = vmatprep.subr.mxu0 %v4592_v24 }
 0xe1f   :  { %v4460_v57 = vpop.eup %4459  ;;  %v2723_v58 = vmul.f32 1.442695, %v2708_v56 }
 0xe20   :  { %v2842_v59 = vpop.permute.xlu0 %2841  ;;  %v2731_v60 = vsel %vm234_vm2, %v4460_v57, 0.0  ;;  %v2918_v5 = vpop.permute.xlu1 %2917 }
 0xe21   :  { %4469 = vpow2.f32 %v2723_v58  ;;  %2732 = vadd.xlane.f32.xlu1 %v2731_v60  ;;  %4246 = vmatpush3.msra.mxu1 %v2842_v59 }
 0xe22   :  { %4255 = vmatprep.subr.mxu1 %v4592_v24 }
 0xe23   :  { %v4462_v61 = vpop.eup %4461 }
 0xe24   :  { %v4464_v62 = vpop.eup %4463  ;;  %v2734_v63 = vsel %vm234_vm2, %v4462_v61, 0.0  ;;  %v2994_v6 = vpop.permute.xlu1 %2993 }
 0xe25   :  { %2735 = vadd.xlane.f32.xlu0 %v2734_v63  ;;  %v2737_v0 = vsel %vm234_vm2, %v4464_v62, 0.0  ;;  %v3070_v7 = vpop.permute.xlu0 %3069 }
 0xe26   :  { %2738 = vadd.xlane.f32.xlu1 %v2737_v0 }
 0xe27   :  { %v4466_v1 = vpop.eup %4465 }
 0xe28   :  { %v4468_v2 = vpop.eup %4467  ;;  %v2740_v3 = vsel %vm234_vm2, %v4466_v1, 0.0  ;;  %v3146_v8 = vpop.permute.xlu1 %3145 }
 0xe29   :  { %2741 = vadd.xlane.f32.xlu0 %v2740_v3  ;;  %v2743_v4 = vsel %vm234_vm2, %v4468_v2, 0.0 }
 0xe2a   :  { %2744 = vadd.xlane.f32.xlu1 %v2743_v4 }
 0xe2b   :  { %v5175_v32 = vpop.eup %4469 }
 0xe2c   :  { %v2746_v36 = vsel %vm234_vm2, %v5175_v32, 0.0 }
 0xe2d   :  { %2747 = vadd.xlane.f32.xlu0 %v2746_v36 }
 0xe3b   :  { %3297 = vrot.lane.b32.xlu1 %v5092_v48, %s4598_s25 }
 0xe43   :  { %3221 = vrot.lane.b32.xlu0 %v5076_v44, %s4598_s25 }
 0xe55   :  { %v2730_v9 = vpop.xlane.xlu0 %2729 }
 0xe56   :  { %4471 = vrcp.f32 %v2730_v9 }
 0xe59   :  { %v2727_v10 = vpop.xlane.xlu1 %2726 }
 0xe5a   :  { %4473 = vrcp.f32 %v2727_v10 }
 0xe60   :  { %v4472_v11 = vpop.eup %4471 }
 0xe61   :  { %v2758_v12 = vmul.f32 %v4472_v11, %v5160_v29 }
 0xe63   :  { %4248 = vmatmul.mubr.msk.f32.vlgmr.msra.gmra.mrb[34].mxu1 %vm234_vm2, %v2758_v12 }
 0xe64   :  { %v4474_v13 = vpop.eup %4473  ;;  %4256 = vmatpush3.msra.mxu1 %v2994_v6  ;;  %4257 = vmatprep.mubr.msk.f32.mxu1 %vm4593_vm1, %v4592_v24 }
 0xe65   :  { %v2757_v44 = vmul.f32 %v4474_v13, %v5164_v31  ;;  %4265 = vmatprep.subr.mxu1 %v4592_v24 }
 0xe67   :  { %4243 = vmatmul.mubr.msk.f32.vlgmr.msra.gmra.mrb[24].mxu0 %vm234_vm2, %v2757_v44 }
 0xe68   :  { %4251 = vmatpush3.msra.mxu0 %v2918_v5  ;;  %4252 = vmatprep.mubr.msk.f32.mxu0 %vm4593_vm1, %v4592_v24 }
 0xe69   :  { %4260 = vmatprep.subr.mxu0 %v4592_v24 }
 0xeae   :  { %v2733_v48 = vpop.xlane.xlu1 %2732 }
 0xeaf   :  { %4475 = vrcp.f32 %v2733_v48 }
 0xeb2   :  { %v2736_v23 = vpop.xlane.xlu0 %2735 }
 0xeb3   :  { %4477 = vrcp.f32 %v2736_v23  ;;  %v2739_v21 = vpop.xlane.xlu1 %2738 }
 0xeb4   :  { %4479 = vrcp.f32 %v2739_v21 }
 0xeb6   :  { %v2742_v14 = vpop.xlane.xlu0 %2741 }
 0xeb7   :  { %4481 = vrcp.f32 %v2742_v14  ;;  %v2745_v15 = vpop.xlane.xlu1 %2744 }
 0xeb8   :  { %4483 = vrcp.f32 %v2745_v15 }
 0xeb9   :  { %v4476_v16 = vpop.eup %4475 }
 0xeba   :  { %v2759_v17 = vmul.f32 %v4476_v16, %v4460_v57  ;;  %v2748_v18 = vpop.xlane.xlu0 %2747 }
 0xebb   :  { %4485 = vrcp.f32 %v2748_v18  ;;  %v3298_v31 = vpop.permute.xlu1 %3297 }
 0xebc   :  { %4253 = vmatmul.mubr.msk.f32.vlgmr.msra.gmra.mrb[26].mxu0 %vm234_vm2, %v2759_v17 }
 0xebd   :  { %v4478_v19 = vpop.eup %4477  ;;  %4261 = vmatpush3.msra.mxu0 %v3070_v7  ;;  %4262 = vmatprep.mubr.msk.f32.mxu0 %vm4593_vm1, %v4592_v24  ;;  %v3906_v7 = vld [vmem:[%s5328_s7 + $0x1] ss:$0 sm:$0xff] }
 0xebe   :  { %v4480_v20 = vpop.eup %4479  ;;  %v2760_v22 = vmul.f32 %v4478_v19, %v4462_v61  ;;  %4270 = vmatprep.subr.mxu0 %v4592_v24  ;;  %v3222_v26 = vpop.permute.xlu0 %3221 }
 0xebf   :  { %v2761_v25 = vmul.f32 %v4480_v20, %v4464_v62 }
 0xec0   :  { %4258 = vmatmul.mubr.msk.f32.vlgmr.msra.gmra.mrb[36].mxu1 %vm234_vm2, %v2760_v22  ;;  %v3914_v22 = vld [vmem:[%s5331_s10 + $0x28] sm:$0xff] }
 0xec1   :  { %v4482_v27 = vpop.eup %4481  ;;  %4263 = vmatmul.mubr.msk.f32.vlgmr.msra.gmra.mrb[28].mxu0 %vm234_vm2, %v2761_v25  ;;  %4266 = vmatpush3.msra.mxu1 %v3146_v8 }
 0xec2   :  { %v4484_v28 = vpop.eup %4483  ;;  %v2762_v29 = vmul.f32 %v4482_v27, %v4466_v1  ;;  %4271 = vmatpush3.msra.mxu0 %v3222_v26  ;;  %4267 = vmatprep.mubr.msk.f32.mxu1 %vm4593_vm1, %v4592_v24  ;;  %v3915_v26 = vld [vmem:[%s5331_s10 + $0x30] sm:$0xff]  ;;  %v3916_v27 = vld [vmem:[%s5331_s10 + $0x38] sm:$0xff] }
 0xec3   :  { %v2763_v30 = vmul.f32 %v4484_v28, %v4468_v2  ;;  %4272 = vmatprep.mubr.msk.f32.mxu0 %vm4593_vm1, %v4592_v24  ;;  %4275 = vmatprep.subr.mxu1 %v4592_v24  ;;  %v4381_v28 = vpack.c.bf16 %v3916_v27, %v3915_v26  ;;  %v3935_v26 = vld [vmem:[%s5335_s14 + $0x1] ss:$0 sm:$0xff]  ;;  %s4602_s14 = smov [#allocation8]  }
 0xec4   :  { %4268 = vmatmul.mubr.msk.f32.vlgmr.msra.gmra.mrb[38].mxu1 %vm234_vm2, %v2762_v29  ;;  %4370 = vmatprep.subr.bf16.mxu0 %v4369_v45  ;;  %v3921_v29 = vld [vmem:[%s5333_s12 + $0x40] sm:$0xff] }
 0xec5   :  { %v4486_v33 = vpop.eup %4485  ;;  %4273 = vmatmul.mubr.msk.f32.vlgmr.msra.gmra.mrb[30].mxu0 %vm234_vm2, %v2763_v30  ;;  %4276 = vmatpush3.msra.mxu1 %v3298_v31  ;;  %v3922_v30 = vld [vmem:[%s5333_s12 + $0x48] sm:$0xff]  ;;  %v3923_v31 = vld [vmem:[%s5333_s12 + $0x50] sm:$0xff] }
 0xec6   :  { %v2764_v37 = vmul.f32 %v4486_v33, %v5175_v32  ;;  %4277 = vmatprep.mubr.msk.f32.mxu1 %vm4593_vm1, %v4592_v24  ;;  %4372 = vmatpush3.bf16.msra.mxu0 %v4369_v45  ;;  %v3903_v24 = vld [vmem:[%s5327_s6 + $0x30] sm:$0xff]  ;;  %v4385_v33 = vpack.c.bf16 %v3922_v30, %v3921_v29  ;;  %v3936_v29 = vld [vmem:[%s5336_s15 + $0x1] ss:$0 sm:$0xff]  ;;  %s3817_s15 = sshll.u32 %s4602_s14, 4  ;;  %s3818_s15 = int_to_ptr.vmem [resolvable:$true] %s3817_s15 }
 0xec7   :  { %v4373_v47 = vpack.c.bf16 %v3904_v46, %v3903_v24  ;;  %s4561_s4 = scalar_lea.vmem %s3818_s15, 32  ;;  %p4566_p11 = scmp.lt.s32.totalorder %s3818_s15, %s3818_s15 }
 0xec8   :  { %4278 = vmatmul.mubr.msk.f32.vlgmr.msra.gmra.mrb[40].mxu1 %vm234_vm2, %v2764_v37  ;;  %v3924_v37 = vld [vmem:[%s5333_s12 + $0x58] sm:$0xff]  ;;  %p4562_p10 = scmp.ne.s32.totalorder %s3818_s15, %s4561_s4  ;;  %p4567_p12 = scmp.lt.s32.totalorder %s4561_s4, %s4561_s4 }
 0xec9   :  { %4374 = vmatprep.subr.bf16.mxu0 %v4373_v47 }
 0xeca   :  { %4376 = vmatpush3.bf16.msra.mxu0 %v4373_v47  ;;  %p4568_p13 = por %p4567_p12, %p4566_p11 }
 0xecb   :  { %4386 = vmatprep.subr.bf16.mxu0 %v4385_v33 }
 0xecc   :  { %p4569_p0 = pnand %p4568_p13, %p4562_p10 }
 0xf36   :  { %v2913_v38 = vpop.f32.mrb[34].mxu1 }
 0xf37   :  { %v4249_v39 = vpop.f32.mrb[35].mxu1 }
 0xf38   :  { %v3925_v39 = vld [vmem:[%s5333_s12 + $0x60] sm:$0xff] }
 0xf3a   :  { %v2837_v40 = vpop.f32.mrb[24].mxu0 }
 0xf3b   :  { %v4244_v41 = vpop.f32.mrb[25].mxu0 }
 0xf8f   :  { %v2989_v49 = vpop.f32.mrb[26].mxu0 }
 0xf90   :  { %3375 = vrot.lane.b32.xlu0 %v2989_v49, %s4599_s20  ;;  %v4254_v50 = vpop.f32.mrb[27].mxu0 }
 0xf91   :  { %v3911_v50 = vld [vmem:[%s5329_s8 + $0x1] ss:$0 sm:$0xff] }
 0xf93   :  { %v3065_v51 = vpop.f32.mrb[36].mxu1 }
 0xf94   :  { %v3141_v52 = vpop.f32.mrb[28].mxu0  ;;  %3377 = vrot.lane.b32.xlu1 %v3065_v51, %s4599_s20  ;;  %v4259_v53 = vpop.f32.mrb[37].mxu1 }
 0xf95   :  { %3383 = vrot.lane.b32.xlu0 %v3141_v52, %s4600_s21  ;;  %v4264_v54 = vpop.f32.mrb[29].mxu0  ;;  %v3912_v52 = vld [vmem:[%s5330_s9 + $0x1] ss:$0 sm:$0xff] }
 0xf97   :  { %v3217_v55 = vpop.f32.mrb[38].mxu1 }
 0xf98   :  { %v3293_v56 = vpop.f32.mrb[30].mxu0  ;;  %3385 = vrot.lane.b32.xlu1 %v3217_v55, %s4600_s21  ;;  %v4269_v57 = vpop.f32.mrb[39].mxu1 }
 0xf99   :  { %3391 = vrot.lane.b32.xlu0 %v3293_v56, %s4601_s23  ;;  %v4274_v58 = vpop.f32.mrb[31].mxu0 }
 0xf9b   :  { %v3369_v59 = vpop.f32.mrb[40].mxu1 }
 0xf9c   :  { %3393 = vrot.lane.b32.xlu1 %v3369_v59, %s4601_s23  ;;  %v4279_v60 = vpop.f32.mrb[41].mxu1  ;;  %v3927_v59 = vld [vmem:[%s5333_s12 + $0x70] sm:$0xff] }
 0xf9d   :  { %v3928_v60 = vld [vmem:[%s5333_s12 + $0x78] sm:$0xff] }
0x1002   :  { %v3376_v61 = vpop.permute.xlu0 %3375 }
0x1003   :  { %v3397_v0 = vsel %vm234_vm2, %v2837_v40, %v3376_v61  ;;  %v3926_v40 = vld [vmem:[%s5333_s12 + $0x68] sm:$0xff]  ;;  %v4397_v61 = vpack.c.bf16 %v3928_v60, %v3927_v59 }
0x1004   :  { %v4393_v41 = vpack.c.bf16 %v3926_v40, %v3925_v39 }
0x1006   :  { %v3378_v62 = vpop.permute.xlu1 %3377 }
0x1007   :  { %v3384_v63 = vpop.permute.xlu0 %3383  ;;  %v3398_v32 = vsel %vm234_vm2, %v2913_v38, %v3378_v62  ;;  %v4389_v38 = vpack.c.bf16 %v3924_v37, %v3923_v31  ;;  %v3918_v62 = vld [vmem:[%s5332_s11 + $0x1] ss:$0 sm:$0xff] }
0x1008   :  { %v3399_v2 = vsel %vm1571_vm3, %v3397_v0, %v3384_v63 }
0x100a   :  { %v3386_v1 = vpop.permute.xlu1 %3385 }
0x100b   :  { %v3392_v3 = vpop.permute.xlu0 %3391  ;;  %v3400_v36 = vsel %vm1571_vm3, %v3398_v32, %v3386_v1  ;;  %v3930_v32 = vld [vmem:[%s5334_s13 + $0x1] ss:$0 sm:$0xff] }
0x100c   :  { %v3401_v4 = vsel %vm1574_vm4, %v3399_v2, %v3392_v3 }
0x100d   :  { %4288 = vmatprep.mubr.msk.f32.mxu0 %vm136_vm0, %v3401_v4 }
0x100e   :  { %v3394_v5 = vpop.permute.xlu1 %3393 }
0x100f   :  { %v3402_v6 = vsel %vm1574_vm4, %v3400_v36, %v3394_v5 }
0x1010   :  { %4289 = vmatmul.mubr.msk.f32.vlgmr.msra.gmra.mrb[32].mxu0 %vm136_vm0, %v3402_v6 }
0x1011   :  { %4388 = vmatpush3.bf16.msra.mxu0 %v4385_v33 }
0x1012   :  { %4390 = vmatprep.subr.bf16.mxu0 %v4389_v38 }
0x1015   :  { %4392 = vmatpush3.bf16.msra.mxu0 %v4389_v38 }
0x1016   :  { %4394 = vmatprep.subr.bf16.mxu0 %v4393_v41 }
0x1019   :  { %4396 = vmatpush3.bf16.msra.mxu0 %v4393_v41 }
0x101a   :  { %4398 = vmatprep.subr.bf16.mxu0 %v4397_v61 }
0x101d   :  { %4400 = vmatpush3.bf16.msra.mxu0 %v4397_v61 }
0x10e3   :  { %v4290_v8 = vpop.f32.mrb[32].mxu0 }
0x10e4   :  { %v3494_v9 = vadd.f32 %v4290_v8, %v3906_v7  ;;  %v3488_v10 = vpop.f32.mrb[33].mxu0 }
0x10e5   :  { %v3489_v11 = vadd.f32 %v3906_v7, %v3488_v10 }
0x10e6   :  { %v3498_v12 = vadd.f32 %v3494_v9, %v5037_v35 }
0x10e7   :  { %v3497_v13 = vadd.f32 %v3489_v11, %v5035_v34  ;;  %v3913_v34 = vld [vmem:[%s5331_s10 + $0x20] sm:$0xff] }
0x10e8   :  { %v3506_v44 = vsel %vm136_vm0, %v3498_v12, 0.0  ;;  %v4377_v25 = vpack.c.bf16 %v3914_v22, %v3913_v34 }
0x10e9   :  { %3507 = vadd.xlane.f32.xlu1 %v3506_v44  ;;  %v3503_v48 = vsel %vm136_vm0, %v3497_v13, 0.0 }
0x10ea   :  { %3504 = vadd.xlane.f32.xlu0 %v3503_v48  ;;  %4378 = vmatprep.subr.bf16.mxu1 %v4377_v25 }
0x10eb   :  { %4380 = vmatpush3.bf16.msra.mxu1 %v4377_v25 }
0x10ec   :  { %4382 = vmatprep.subr.bf16.mxu1 %v4381_v28 }
0x10ef   :  { %4384 = vmatpush3.bf16.msra.mxu1 %v4381_v28 }
0x1176   :  { %v3508_v23 = vpop.xlane.xlu1 %3507 }
0x1177   :  { %v3510_v21 = vmul.f32 0.03125, %v3508_v23  ;;  %v3505_v14 = vpop.xlane.xlu0 %3504 }
0x1178   :  { %v3509_v15 = vmul.f32 0.03125, %v3505_v14 }
0x1179   :  { %v3512_v16 = vsub.f32 %v3498_v12, %v3510_v21 }
0x117a   :  { %v3511_v17 = vsub.f32 %v3497_v13, %v3509_v15 }
0x117b   :  { %v3514_v20 = vmul.f32 %v3512_v16, %v3512_v16 }
0x117c   :  { %v3513_v18 = vmul.f32 %v3511_v17, %v3511_v17 }
0x117d   :  { %v3518_v35 = vsel %vm136_vm0, %v3514_v20, 0.0 }
0x117e   :  { %v3515_v19 = vsel %vm136_vm0, %v3513_v18, 0.0 }
0x117f   :  { %3516 = vadd.xlane.f32.xlu0 %v3515_v19 }
0x1183   :  { %3519 = vadd.xlane.f32.xlu0 %v3518_v35 }
0x120c   :  { %v3517_v42 = vpop.xlane.xlu0 %3516 }
0x120d   :  { %v3521_v43 = vmul.f32 0.03125, %v3517_v42 }
0x120f   :  { %v3523_v45 = vadd.f32 1e-05, %v3521_v43 }
0x1210   :  { %v3520_v24 = vpop.xlane.xlu0 %3519 }
0x1211   :  { %4487 = vrsqrt.f32 %v3523_v45  ;;  %v3522_v46 = vmul.f32 0.03125, %v3520_v24 }
0x1213   :  { %v3524_v47 = vadd.f32 1e-05, %v3522_v46 }
0x1215   :  { %4489 = vrsqrt.f32 %v3524_v47 }
0x121b   :  { %v4488_v49 = vpop.eup %4487 }
0x121c   :  { %v3527_v51 = vmul.f32 %v4488_v49, %v3511_v17 }
0x121e   :  { %v3535_v53 = vmul.f32 %v3911_v50, %v3527_v51 }
0x121f   :  { %v4490_v54 = vpop.eup %4489 }
0x1220   :  { %v3528_v55 = vmul.f32 %v4490_v54, %v3512_v16  ;;  %v3543_v56 = vadd.f32 %v3912_v52, %v3535_v53 }
0x1222   :  { %v3536_v57 = vmul.f32 %v3911_v50, %v3528_v55  ;;  %4299 = vmatprep.mubr.msk.f32.mxu1 %vm136_vm0, %v3543_v56 }
0x1224   :  { %v3544_v58 = vadd.f32 %v3912_v52, %v3536_v57 }
0x1226   :  { %4300 = vmatmul.mubr.msk.f32.vlgmr.msra.gmra.mrb[42].mxu1 %vm136_vm0, %v3544_v58 }
0x12f9   :  { %v4301_v63 = vpop.f32.mrb[42].mxu1 }
0x12fa   :  { %v3636_v0 = vadd.f32 %v4301_v63, %v3918_v62  ;;  %v3630_v1 = vpop.f32.mrb[43].mxu1 }
0x12fb   :  { %v3631_v2 = vadd.f32 %v3918_v62, %v3630_v1 }
0x12fc   :  { %v3640_v4 = vmax.f32 %v3636_v0, 0.0 }
0x12fd   :  { %v3639_v3 = vmax.f32 %v3631_v2, 0.0 }
0x12ff   :  { %4318 = vmatprep.mubr.msk.f32.mxu0 %vm1825_vm5, %v3639_v3 }
0x1300   :  { %4319 = vmatmul.mubr.msk.f32.vlgmr.msra.gmra.mrb[34].mxu0 %vm1825_vm5, %v3640_v4 }
0x13d3   :  { %v4320_v36 = vpop.f32.mrb[34].mxu0 }
0x13d4   :  { %v3736_v5 = vadd.f32 %v4320_v36, %v3930_v32  ;;  %v3730_v6 = vpop.f32.mrb[35].mxu0 }
0x13d5   :  { %v3731_v7 = vadd.f32 %v3930_v32, %v3730_v6 }
0x13d6   :  { %v3740_v8 = vadd.f32 %v3736_v5, %v3544_v58 }
0x13d7   :  { %v3739_v9 = vadd.f32 %v3731_v7, %v3543_v56 }
0x13d8   :  { %v3748_v10 = vsel %vm136_vm0, %v3740_v8, 0.0 }
0x13d9   :  { %3749 = vadd.xlane.f32.xlu0 %v3748_v10  ;;  %v3745_v11 = vsel %vm136_vm0, %v3739_v9, 0.0 }
0x13da   :  { %3746 = vadd.xlane.f32.xlu1 %v3745_v11 }
0x1466   :  { %v3750_v12 = vpop.xlane.xlu0 %3749 }
0x1467   :  { %v3752_v13 = vmul.f32 0.03125, %v3750_v12  ;;  %v3747_v44 = vpop.xlane.xlu1 %3746 }
0x1468   :  { %v3751_v48 = vmul.f32 0.03125, %v3747_v44 }
0x1469   :  { %v3754_v23 = vsub.f32 %v3740_v8, %v3752_v13 }
0x146a   :  { %v3753_v21 = vsub.f32 %v3739_v9, %v3751_v48 }
0x146b   :  { %v3756_v14 = vmul.f32 %v3754_v23, %v3754_v23 }
0x146c   :  { %v3755_v15 = vmul.f32 %v3753_v21, %v3753_v21 }
0x146d   :  { %v3760_v16 = vsel %vm136_vm0, %v3756_v14, 0.0 }
0x146e   :  { %3761 = vadd.xlane.f32.xlu0 %v3760_v16  ;;  %v3757_v17 = vsel %vm136_vm0, %v3755_v15, 0.0 }
0x146f   :  { %3758 = vadd.xlane.f32.xlu1 %v3757_v17 }
0x14fb   :  { %v3762_v18 = vpop.xlane.xlu0 %3761 }
0x14fc   :  { %v3764_v19 = vmul.f32 0.03125, %v3762_v18  ;;  %v3759_v20 = vpop.xlane.xlu1 %3758 }
0x14fd   :  { %v3763_v35 = vmul.f32 0.03125, %v3759_v20 }
0x14fe   :  { %v3766_v34 = vadd.f32 1e-05, %v3764_v19 }
0x14ff   :  { %v3765_v22 = vadd.f32 1e-05, %v3763_v35 }
0x1500   :  { %4491 = vrsqrt.f32 %v3766_v34 }
0x1501   :  { %4493 = vrsqrt.f32 %v3765_v22 }
0x150a   :  { %v4492_v25 = vpop.eup %4491 }
0x150b   :  { %v4494_v27 = vpop.eup %4493  ;;  %v3770_v28 = vmul.f32 %v4492_v25, %v3754_v23 }
0x150c   :  { %v3769_v30 = vmul.f32 %v4494_v27, %v3753_v21 }
0x150d   :  { %v3778_v31 = vmul.f32 %v3935_v26, %v3770_v28 }
0x150e   :  { %v3777_v33 = vmul.f32 %v3935_v26, %v3769_v30 }
0x150f   :  { %v3786_v37 = vadd.f32 %v3936_v29, %v3778_v31 }
0x1510   :  { %v3785_v38 = vadd.f32 %v3936_v29, %v3777_v33 }
0x1511   :  { %v3794_v39 = vsel %vm136_vm0, %v3786_v37, 0.0 }
0x1512   :  { %v3787_v40 = vsel %vm136_vm0, %v3785_v38, 0.0  ;;  %v3795_v41 = vrot.slane %v3794_v39, 4 }
0x1513   :  { %v3788_v42 = vrot.slane %v3787_v40, 4 }
0x1514   :  { %v3796_v43 = vadd.f32 %v3795_v41, %v3794_v39 }
0x1515   :  { %v3789_v45 = vadd.f32 %v3788_v42, %v3787_v40 }
0x1516   :  { %v3797_v24 = vrot.slane %v3796_v43, 2 }
0x1517   :  { %v3790_v46 = vrot.slane %v3789_v45, 2 }
0x1518   :  { %v3798_v47 = vadd.f32 %v3797_v24, %v3796_v43 }
0x1519   :  { %v3791_v49 = vadd.f32 %v3790_v46, %v3789_v45 }
0x151a   :  { %v3799_v50 = vrot.slane %v3798_v47, 1 }
0x151b   :  { %v3792_v51 = vrot.slane %v3791_v49, 1 }
0x151c   :  { %v3800_v52 = vadd.f32 %v3799_v50, %v3798_v47 }
0x151d   :  { %v3793_v53 = vadd.f32 %v3792_v51, %v3791_v49 }
0x151e   :  { %v3803_v54 = vmul.f32 0.125, %v3800_v52 }
0x151f   :  { %v3802_v55 = vmul.f32 0.125, %v3793_v53 }
0x1521   :  { %v3807_v56 = vsel %vm3806_vm6, %v3803_v54, %v3802_v55 }
0x1522   :  { %3810 = vst.msk [vmem:[#allocation8] sm:$0x3] %vm3809_vm7, %v3807_v56 }
0x1523   :  { %4572 = shalt.err (!%p4569_p0)
}
0x1524   :  { %s4573_s17 = scalar_lea.hbm %s5337_s16, 32 }
0x1525   :  { %p4574_p1 = scmp.ne.s32.totalorder %s5337_s16, %s4573_s17  ;;  %p4577_p2 = scmp.lt.u32.totalorder %s4573_s17, %s5337_s16 }
0x1527   :  { %p4579_p3 = pnand %p4577_p2, %p4574_p1 }
0x1529   :  { %4582 = shalt.err (!%p4579_p3)
}
0x152a   :  { %3820 = dma.vmem_to_hbm [thread:$0]  %s3818_s15, 32, %s5337_s16, [#allocation4]  }
0x152b   :  { %4587 = dma.done.wait [#allocation4], 32  }
0x152c   :  { %4588 = vsyncadd [#allocation4], 4294967264 }
0x152d   :  { %3824 = vsyncpa [#allocation3], 1 }
0x152e   :  { %3825 = vsyncpa [#allocation6], 1 }
0x152f   :  { %3826 = vsyncpa [#allocation4], 1 }

</bundles_post_ra>
